<compile_context>
chip_gen: v6e
topology: v6e:2x2x1
jax: 0.10.0
libtpu: 0.0.40
codegen_flags: <defaults>
</compile_context>

<pallas_src>
import functools
from typing import NamedTuple

import jax
import jax.numpy as jnp
from jax.experimental import pallas as pl
from jax.experimental.pallas import tpu as pltpu


def _round_up(a, b):
    return ((a + b - 1) // b) * b


def sat_query_kernel(x_ref, sat_ref, out_ref, *, H, W, W_pad, C_pad, UC,
                     num_uchunks):
    f32 = jnp.float32
    TN = x_ref.shape[1]
    rows = UC * C_pad                                   # stage-1 rows per chunk

    xv = x_ref[...].astype(f32)                         # (4, TN)
    cu, cv = xv[0:1, :], xv[1:2, :]
    du_in, dv_in = xv[2:3, :], xv[3:4, :]

    su = cu - du_in * 0.5
    eu = cu + du_in * 0.5
    sv = cv - dv_in * 0.5
    ev = cv + dv_in * 0.5

    swapx = du_in < 0.0
    nsu = jnp.where(swapx, eu, su)
    neu = jnp.where(swapx, su, eu)
    swapy = dv_in < 0.0
    nsv = jnp.where(swapy, ev, sv)
    nev = jnp.where(swapy, sv, ev)

    # fractional wrap into [0, 1)
    nsu = nsu - jnp.floor(nsu)
    neu = neu - jnp.floor(neu)
    nsv = nsv - jnp.floor(nsv)
    nev = nev - jnp.floor(nev)

    Hf = jnp.float32(H)
    Wf = jnp.float32(W)
    duf = jnp.float32(1.0) / Hf
    dvf = jnp.float32(1.0) / Wf
    bru = jnp.full_like(neu, 1.0 - duf * 0.5)           # (1, TN)
    brv = jnp.full_like(nev, 1.0 - dvf * 0.5)           # (1, TN)

    # Wrap flags: the reference's 4 disjoint condition masks (c1..c4)
    # factorize into products of wu / wv.
    wu = (nsu > neu).astype(f32)                        # (1, TN)
    wv = (nsv > nev).astype(f32)                        # (1, TN)

    def texel(res_f, res_i, p):
        idx = jnp.floor(res_f * p - 0.5).astype(jnp.int32)
        inb = ((idx >= 0) & (idx < res_i)).astype(f32)
        return idx, inb

    # 3 unique u texels x 3 unique v texels; separable signed coefficients
    # with in-bounds masks folded in.
    iu0, ub0 = texel(Hf, H, neu)                        # eu corner
    iu1, ub1 = texel(Hf, H, bru)                        # wrapped-right corner
    iu2, ub2 = texel(Hf, H, nsu - duf)                  # su - du corner
    ius = (iu0, iu1, iu2)
    aus = (ub0, wu * ub1, -ub2)

    iv0, vb0 = texel(Wf, W, nev)
    iv1, vb1 = texel(Wf, W, brv)
    iv2, vb2 = texel(Wf, W, nsv - dvf)
    ivs = (iv0, iv1, iv2)
    bvs = (vb0, wv * vb1, -vb2)

    # Hoisted iotas (JAX does not CSE broadcast_in_dim inside loops).
    iota_v = jax.lax.broadcasted_iota(jnp.int32, (W_pad, TN), 0)
    iota_u = jax.lax.broadcasted_iota(jnp.int32, (UC, TN), 0)

    # Stage-1 RHS: B[v, n] = sum_j b_j[n] * [v == iv_j[n]]   -> (W_pad, TN).
    bmat = jnp.where(iota_v == ivs[0], bvs[0], 0.0)
    bmat = bmat + jnp.where(iota_v == ivs[1], bvs[1], 0.0)
    bmat = bmat + jnp.where(iota_v == ivs[2], bvs[2], 0.0)

    def chunk_contribution(base_u, sat_chunk):
        # A[u, n] = sum_i a_i[n] * [u + base_u == iu_i[n]]   -> (UC, TN).
        amat = jnp.where(iota_u == ius[0] - base_u, aus[0], 0.0)
        amat = amat + jnp.where(iota_u == ius[1] - base_u, aus[1], 0.0)
        amat = amat + jnp.where(iota_u == ius[2] - base_u, aus[2], 0.0)
        # Stage 1 (MXU): T[u*C_pad + c, n] = sum_v sat[u, v, c] * B[v, n].
        t = jnp.dot(sat_chunk, bmat, preferred_element_type=jnp.float32)
        # Stage 2 (VPU): out[c, n] += sum_u A[u, n] * T[u*C_pad + c, n].
        # Static 8-row slices (tile aligned, C_pad is a multiple of 8).
        contrib = jnp.zeros((C_pad, TN), f32)
        for k in range(UC):
            contrib = contrib + t[k * C_pad:(k + 1) * C_pad, :] * amat[k:k + 1, :]
        return contrib

    if num_uchunks == 1:
        acc = chunk_contribution(0, sat_ref[...].astype(f32))
    else:
        def body(k, acc):
            row0 = pl.multiple_of(k * rows, 8)
            sat_chunk = sat_ref[pl.ds(row0, rows), :].astype(f32)
            return acc + chunk_contribution(k * UC, sat_chunk)

        # Unroll >= 2 so the next chunk's A/B-style VALU work can co-issue with
        # this chunk's MXU matmul (different VLIW slots).
        acc = jax.lax.fori_loop(
            0, num_uchunks, body, jnp.zeros((C_pad, TN), jnp.float32),
            unroll=(True if num_uchunks <= 4 else 2))

    out_ref[...] = acc.astype(out_ref.dtype)


class PreparedSAT(NamedTuple):
    sat_r: jax.Array          # (H_pad * C_pad, W_pad), u-major / channel-minor
    H: int
    W: int
    C: int
    C_pad: int
    H_pad: int
    W_pad: int
    UC: int
    num_uchunks: int


def prepare_sat(sat, start_idx=-1, len_idx=1, *, uc=64):
    """Pad/transpose the SAT into the kernel's resident layout.

    Call once and reuse across forward calls: the pad + transpose is a full
    HBM round trip of the table and is pure wrapper overhead if repeated.
    Any start_idx/len_idx channel slice is baked in here.
    """
    H, W = int(sat.shape[0]), int(sat.shape[1])
    sat_c = sat.reshape(H, W, -1)
    if start_idx >= 0:
        sat_c = sat_c[:, :, start_idx:start_idx + len_idx]
    C = int(sat_c.shape[-1])

    C_pad = _round_up(C, 8)                   # full sublane groups
    H_pad0 = _round_up(H, 8)
    UC = min(H_pad0, _round_up(max(int(uc), 8), 8))
    H_pad = _round_up(H_pad0, UC)
    num_uchunks = H_pad // UC
    W_pad = _round_up(W, 128)                 # lane-dense matmul contraction

    sat_p = jnp.pad(sat_c, ((0, H_pad - H), (0, W_pad - W), (0, C_pad - C)))
    # sat_r[u * C_pad + c, v] = sat[u, v, c]; a u-chunk is a contiguous block.
    sat_r = jnp.transpose(sat_p, (0, 2, 1)).reshape(H_pad * C_pad, W_pad)
    return PreparedSAT(sat_r, H, W, C, C_pad, H_pad, W_pad, UC, num_uchunks)


def torch_sat_forward(x, sat, start_idx=-1, len_idx=1, *, tn=256, uc=64):
    """Pallas equivalent of TorchSAT.forward.

    sat: (H, W, C) table or a PreparedSAT (channel slice already applied).
    x:   (N, 4) rows [u_center, v_center, du, dv].
    """
    if isinstance(sat, PreparedSAT):
        prep = sat
    else:
        prep = prepare_sat(sat, start_idx, len_idx, uc=uc)

    N = x.shape[0]
    N_pad = _round_up(max(N, 1), tn)
    if N_pad != N:
        x = jnp.concatenate(
            [x, jnp.zeros((N_pad - N, x.shape[1]), x.dtype)], axis=0)
    x_t = jnp.transpose(x)                                   # (4, N_pad)

    R = prep.H_pad * prep.C_pad
    kernel = functools.partial(
        sat_query_kernel, H=prep.H, W=prep.W, W_pad=prep.W_pad,
        C_pad=prep.C_pad, UC=prep.UC, num_uchunks=prep.num_uchunks)

    sat_bytes = prep.sat_r.size * prep.sat_r.dtype.itemsize
    x_bytes = x_t.size * x_t.dtype.itemsize
    out_bytes = prep.C_pad * N_pad * prep.sat_r.dtype.itemsize
    try:
        vmem_cap = pltpu.get_tpu_info().vmem_capacity_bytes
    except Exception:
        vmem_cap = 64 * 1024 * 1024          # conservative: v7x per-core VMEM
    vmem_cap_budget = int(vmem_cap * 0.8)    # headroom for Mosaic scratch etc.

    def build(single_buffer_sat):
        sat_kwargs = {}
        n_sat_bufs = 2
        if single_buffer_sat:
            # The SAT block index is constant across the grid -> one DMA; a
            # single buffer halves its VMEM footprint vs default pipelining.
            sat_kwargs["pipeline_mode"] = pl.Buffered(1)
            n_sat_bufs = 1
        vmem_need = n_sat_bufs * sat_bytes + 8 * 1024 * 1024
        vmem_limit = int(min(vmem_cap_budget,
                             max(32 * 1024 * 1024, vmem_need)))
        grid_spec = pltpu.PrefetchScalarGridSpec(
            num_scalar_prefetch=0,
            grid=(N_pad // tn,),
            in_specs=[
                pl.BlockSpec((4, tn), lambda i: (0, i)),               # x tile
                pl.BlockSpec((R, prep.W_pad), lambda i: (0, 0),        # SAT
                             **sat_kwargs),
            ],
            out_specs=pl.BlockSpec((prep.C_pad, tn), lambda i: (0, i)),
        )
        return pl.pallas_call(
            kernel,
            out_shape=jax.ShapeDtypeStruct((prep.C_pad, N_pad),
                                           prep.sat_r.dtype),
            grid_spec=grid_spec,
            compiler_params=pltpu.CompilerParams(
                dimension_semantics=("parallel",),
                vmem_limit_bytes=vmem_limit,
            ),
            cost_estimate=pl.CostEstimate(
                flops=2 * N_pad * R * (prep.W_pad + 1),
                transcendentals=0,
                bytes_accessed=sat_bytes + x_bytes + out_bytes,
            ),
        )

    # TODO(synk): for SATs larger than the VMEM budget, stream the H axis over
    # an "arbitrary" grid dimension with a VMEM accumulator instead of keeping
    # the whole table resident (matters most on v7x's 64 MiB VMEM).
    try:
        out_t = build(True)(x_t, prep.sat_r)
    except Exception:
        # Fallback if this JAX/Mosaic build rejects pl.Buffered(1): default
        # (double-buffered) resident SAT — same math, more VMEM.
        out_t = build(False)(x_t, prep.sat_r)

    return jnp.transpose(out_t)[:N, :prep.C]


def ref_forward(x, sat, start_idx=-1, len_idx=1):
    """Pure-JAX reference mirroring the PyTorch module."""
    H, W = sat.shape[0], sat.shape[1]
    sat_flat = sat.reshape(-1, sat.shape[-1])
    if start_idx >= 0:
        sat_flat = sat_flat[:, start_idx:start_idx + len_idx]
    resf = jnp.array([H, W], jnp.float32)
    resi = jnp.array([H, W], jnp.int32)
    du, dv = 1.0 / H, 1.0 / W
    duv = jnp.array([du, dv], jnp.float32)

    def sample(p):
        idx = jnp.floor(resf * p - 0.5).astype(jnp.int32)
        zero = jnp.any((idx < 0) | (idx >= resi), axis=-1, keepdims=True)
        lin = idx[:, 0] * W + idx[:, 1]
        vals = sat_flat[jnp.clip(lin, 0, H * W - 1)]
        return jnp.where(zero, 0.0, vals)

    def query(suv, euv):
        r = sample(euv)
        r = r + sample(suv - duv)
        r = r - sample(jnp.stack([suv[:, 0] - du, euv[:, 1]], -1))
        r = r - sample(jnp.stack([euv[:, 0], suv[:, 1] - dv], -1))
        return r

    d = x[:, 2:]
    c = x[:, :2]
    suv = c - d / 2
    euv = c + d / 2
    swapx = d[:, 0] < 0
    nsu = jnp.where(swapx, euv[:, 0], suv[:, 0])
    neu = jnp.where(swapx, suv[:, 0], euv[:, 0])
    swapy = d[:, 1] < 0
    nsv = jnp.where(swapy, euv[:, 1], suv[:, 1])
    nev = jnp.where(swapy, suv[:, 1], euv[:, 1])
    nsu = nsu - jnp.floor(nsu)
    nsv = nsv - jnp.floor(nsv)
    neu = neu - jnp.floor(neu)
    nev = nev - jnp.floor(nev)
    nsuv = jnp.stack([nsu, nsv], -1)
    neuv = jnp.stack([neu, nev], -1)
    N = x.shape[0]
    bru = jnp.full((N,), 1 - du / 2, jnp.float32)
    brv = jnp.full((N,), 1 - dv / 2, jnp.float32)
    tlu = 1 - bru
    tlv = 1 - brv

    c1 = ((nsu <= neu) & (nsv <= nev))[:, None]
    result = jnp.where(c1, query(nsuv, neuv), 0.0)
    c2 = ((nsu > neu) & (nsv <= nev))[:, None]
    result += jnp.where(c2, query(nsuv, jnp.stack([bru, nev], -1)), 0.0)
    result += jnp.where(c2, query(jnp.stack([tlu, nsv], -1), neuv), 0.0)
    c3 = ((nsu <= neu) & (nsv > nev))[:, None]
    result += jnp.where(c3, query(nsuv, jnp.stack([neu, brv], -1)), 0.0)
    result += jnp.where(c3, query(jnp.stack([nsu, tlv], -1), neuv), 0.0)
    c4 = ((nsu > neu) & (nsv > nev))[:, None]
    result += jnp.where(c4, query(jnp.stack([tlu, tlv], -1), neuv), 0.0)
    result += jnp.where(c4, query(nsuv, jnp.stack([bru, brv], -1)), 0.0)
    result += jnp.where(c4, query(jnp.stack([nsu, tlv], -1),
                                  jnp.stack([bru, nev], -1)), 0.0)
    result += jnp.where(c4, query(jnp.stack([tlu, nsv], -1),
                                  jnp.stack([neu, brv], -1)), 0.0)
    return result


def _check(name, out, ref, rtol=1e-4, atol=5e-4):
    err = float(jnp.max(jnp.abs(out - ref)))
    assert jnp.allclose(out, ref, rtol=rtol, atol=atol), (
        f"{name}: max abs err {err}")


if __name__ == "__main__":
    key = jax.random.PRNGKey(0)
    k1, k2, k3, k4, k5, k6 = jax.random.split(key, 6)

    # ----- Config 1: H=W=16, C=4, N=200 (N not a multiple of the tile) -----
    H, W, C, N = 16, 16, 4, 200
    base = jax.random.uniform(k1, (H, W, C), jnp.float32)
    sat = jnp.cumsum(jnp.cumsum(base, axis=0), axis=1)   # actual SAT
    cuv = jax.random.uniform(k2, (N, 2), jnp.float32)
    duv = jax.random.uniform(k3, (N, 2), jnp.float32, minval=-0.5, maxval=0.5)
    x = jnp.concatenate([cuv, duv], axis=-1)             # (N, 4)

    ref = jax.block_until_ready(ref_forward(x, sat))

    # Default path (single u-chunk, tn=256).
    out = jax.block_until_ready(torch_sat_forward(x, sat))
    assert out.shape == (N, C) and out.dtype == jnp.float32
    _check("default", out, ref)

    # Multi-u-chunk path (uc=8 -> 2 chunks through the fori_loop).
    out2 = jax.block_until_ready(torch_sat_forward(x, sat, uc=8))
    _check("multi-chunk", out2, ref)

    # Prepared-SAT (hoisted pad/transpose) path.
    prep = prepare_sat(sat)
    out3 = jax.block_until_ready(torch_sat_forward(x, prep))
    _check("prepared", out3, ref)

    # start_idx / len_idx channel-slice path.
    ref_s = jax.block_until_ready(ref_forward(x, sat, 1, 2))
    out_s = jax.block_until_ready(torch_sat_forward(x, sat, 1, 2))
    assert out_s.shape == (N, 2)
    _check("channel-slice", out_s, ref_s)

    # ----- Config 2: non-multiple-of-8 H, C=3 (exercises H/C/W padding) -----
    H2, W2, C2, N2 = 9, 32, 3, 130
    base2 = jax.random.uniform(k4, (H2, W2, C2), jnp.float32)
    sat2 = jnp.cumsum(jnp.cumsum(base2, axis=0), axis=1)
    cuv2 = jax.random.uniform(k5, (N2, 2), jnp.float32)
    duv2 = jax.random.uniform(k6, (N2, 2), jnp.float32, minval=-0.5, maxval=0.5)
    x2 = jnp.concatenate([cuv2, duv2], axis=-1)

    ref2 = jax.block_until_ready(ref_forward(x2, sat2))
    out4 = jax.block_until_ready(torch_sat_forward(x2, sat2, uc=8))
    assert out4.shape == (N2, C2)
    _check("padded-dims", out4, ref2)

    print("KERNEL_OK")
</pallas_src>

<mosaic_0001>
module attributes {stable_mosaic.version = 11 : i64} {
  func.func @sat_query_kernel(%arg0: i32, %arg1: memref<4x256xf32, #tpu.memory_space<vmem>>, %arg2: memref<128x128xf32, #tpu.memory_space<vmem>>, %arg3: memref<8x256xf32, #tpu.memory_space<vmem>>) attributes {dimension_semantics = [#tpu.dimension_semantics<parallel>], iteration_bounds = array<i64: 1>, scalar_prefetch = 0 : i64, scratch_operands = 0 : i64, tpu.core_type = #tpu.core_type<tc>, window_params = [{transform_indices = @transform_0, window_bounds = array<i64: 4, 256>}, {pipeline_mode = #tpu.pipeline_mode<synchronous>, transform_indices = @transform_1, window_bounds = array<i64: 128, 128>}, {transform_indices = @transform_2, window_bounds = array<i64: 8, 256>}]} {
    %c0 = arith.constant 0 : index
    %c0_0 = arith.constant 0 : index
    %0 = vector.load %arg1[%c0, %c0_0] : memref<4x256xf32, #tpu.memory_space<vmem>>, vector<4x256xf32>
    %1 = vector.extract_strided_slice %0 {offsets = [0, 0], sizes = [1, 256], strides = [1, 1]} : vector<4x256xf32> to vector<1x256xf32>
    %2 = vector.extract_strided_slice %0 {offsets = [1, 0], sizes = [1, 256], strides = [1, 1]} : vector<4x256xf32> to vector<1x256xf32>
    %3 = vector.extract_strided_slice %0 {offsets = [2, 0], sizes = [1, 256], strides = [1, 1]} : vector<4x256xf32> to vector<1x256xf32>
    %4 = vector.extract_strided_slice %0 {offsets = [3, 0], sizes = [1, 256], strides = [1, 1]} : vector<4x256xf32> to vector<1x256xf32>
    %cst = arith.constant 5.000000e-01 : f32
    %5 = vector.broadcast %cst : f32 to vector<1x256xf32>
    %6 = arith.mulf %3, %5 : vector<1x256xf32>
    %7 = arith.subf %1, %6 : vector<1x256xf32>
    %cst_1 = arith.constant 5.000000e-01 : f32
    %8 = vector.broadcast %cst_1 : f32 to vector<1x256xf32>
    %9 = arith.mulf %3, %8 : vector<1x256xf32>
    %10 = arith.addf %1, %9 : vector<1x256xf32>
    %cst_2 = arith.constant 5.000000e-01 : f32
    %11 = vector.broadcast %cst_2 : f32 to vector<1x256xf32>
    %12 = arith.mulf %4, %11 : vector<1x256xf32>
    %13 = arith.subf %2, %12 : vector<1x256xf32>
    %cst_3 = arith.constant 5.000000e-01 : f32
    %14 = vector.broadcast %cst_3 : f32 to vector<1x256xf32>
    %15 = arith.mulf %4, %14 : vector<1x256xf32>
    %16 = arith.addf %2, %15 : vector<1x256xf32>
    %cst_4 = arith.constant 0.000000e+00 : f32
    %17 = vector.broadcast %cst_4 : f32 to vector<1x256xf32>
    %18 = arith.cmpf olt, %3, %17 : vector<1x256xf32>
    %19 = arith.select %18, %10, %7 : vector<1x256xi1>, vector<1x256xf32>
    %20 = arith.select %18, %7, %10 : vector<1x256xi1>, vector<1x256xf32>
    %cst_5 = arith.constant 0.000000e+00 : f32
    %21 = vector.broadcast %cst_5 : f32 to vector<1x256xf32>
    %22 = arith.cmpf olt, %4, %21 : vector<1x256xf32>
    %23 = arith.select %22, %16, %13 : vector<1x256xi1>, vector<1x256xf32>
    %24 = arith.select %22, %13, %16 : vector<1x256xi1>, vector<1x256xf32>
    %25 = math.floor %19 : vector<1x256xf32>
    %26 = arith.subf %19, %25 : vector<1x256xf32>
    %27 = math.floor %20 : vector<1x256xf32>
    %28 = arith.subf %20, %27 : vector<1x256xf32>
    %29 = math.floor %23 : vector<1x256xf32>
    %30 = arith.subf %23, %29 : vector<1x256xf32>
    %31 = math.floor %24 : vector<1x256xf32>
    %32 = arith.subf %24, %31 : vector<1x256xf32>
    %cst_6 = arith.constant 1.000000e+00 : f32
    %cst_7 = arith.constant 1.600000e+01 : f32
    %33 = arith.divf %cst_6, %cst_7 : f32
    %cst_8 = arith.constant 1.000000e+00 : f32
    %cst_9 = arith.constant 1.600000e+01 : f32
    %34 = arith.divf %cst_8, %cst_9 : f32
    %cst_10 = arith.constant 5.000000e-01 : f32
    %35 = arith.mulf %33, %cst_10 : f32
    %cst_11 = arith.constant 1.000000e+00 : f32
    %36 = arith.subf %cst_11, %35 : f32
    %37 = vector.broadcast %36 : f32 to vector<1x256xf32>
    %cst_12 = arith.constant 5.000000e-01 : f32
    %38 = arith.mulf %34, %cst_12 : f32
    %cst_13 = arith.constant 1.000000e+00 : f32
    %39 = arith.subf %cst_13, %38 : f32
    %40 = vector.broadcast %39 : f32 to vector<1x256xf32>
    %41 = arith.cmpf ogt, %26, %28 : vector<1x256xf32>
    %42 = arith.extui %41 : vector<1x256xi1> to vector<1x256xi32>
    %43 = arith.sitofp %42 : vector<1x256xi32> to vector<1x256xf32>
    %44 = arith.cmpf ogt, %30, %32 : vector<1x256xf32>
    %45 = arith.extui %44 : vector<1x256xi1> to vector<1x256xi32>
    %46 = arith.sitofp %45 : vector<1x256xi32> to vector<1x256xf32>
    %cst_14 = arith.constant 1.600000e+01 : f32
    %47 = vector.broadcast %cst_14 : f32 to vector<1x256xf32>
    %48 = arith.mulf %47, %28 : vector<1x256xf32>
    %cst_15 = arith.constant 5.000000e-01 : f32
    %49 = vector.broadcast %cst_15 : f32 to vector<1x256xf32>
    %50 = arith.subf %48, %49 : vector<1x256xf32>
    %51 = math.floor %50 : vector<1x256xf32>
    %52 = arith.fptosi %51 : vector<1x256xf32> to vector<1x256xi32>
    %c0_i32 = arith.constant 0 : i32
    %53 = vector.broadcast %c0_i32 : i32 to vector<1x256xi32>
    %54 = arith.cmpi sge, %52, %53 : vector<1x256xi32>
    %c16_i32 = arith.constant 16 : i32
    %55 = vector.broadcast %c16_i32 : i32 to vector<1x256xi32>
    %56 = arith.cmpi slt, %52, %55 : vector<1x256xi32>
    %57 = arith.andi %54, %56 : vector<1x256xi1>
    %58 = arith.extui %57 : vector<1x256xi1> to vector<1x256xi32>
    %59 = arith.sitofp %58 : vector<1x256xi32> to vector<1x256xf32>
    %cst_16 = arith.constant 1.600000e+01 : f32
    %60 = vector.broadcast %cst_16 : f32 to vector<1x256xf32>
    %61 = arith.mulf %60, %37 : vector<1x256xf32>
    %cst_17 = arith.constant 5.000000e-01 : f32
    %62 = vector.broadcast %cst_17 : f32 to vector<1x256xf32>
    %63 = arith.subf %61, %62 : vector<1x256xf32>
    %64 = math.floor %63 : vector<1x256xf32>
    %65 = arith.fptosi %64 : vector<1x256xf32> to vector<1x256xi32>
    %c0_i32_18 = arith.constant 0 : i32
    %66 = vector.broadcast %c0_i32_18 : i32 to vector<1x256xi32>
    %67 = arith.cmpi sge, %65, %66 : vector<1x256xi32>
    %c16_i32_19 = arith.constant 16 : i32
    %68 = vector.broadcast %c16_i32_19 : i32 to vector<1x256xi32>
    %69 = arith.cmpi slt, %65, %68 : vector<1x256xi32>
    %70 = arith.andi %67, %69 : vector<1x256xi1>
    %71 = arith.extui %70 : vector<1x256xi1> to vector<1x256xi32>
    %72 = arith.sitofp %71 : vector<1x256xi32> to vector<1x256xf32>
    %73 = vector.broadcast %33 : f32 to vector<1x256xf32>
    %74 = arith.subf %26, %73 : vector<1x256xf32>
    %cst_20 = arith.constant 1.600000e+01 : f32
    %75 = vector.broadcast %cst_20 : f32 to vector<1x256xf32>
    %76 = arith.mulf %75, %74 : vector<1x256xf32>
    %cst_21 = arith.constant 5.000000e-01 : f32
    %77 = vector.broadcast %cst_21 : f32 to vector<1x256xf32>
    %78 = arith.subf %76, %77 : vector<1x256xf32>
    %79 = math.floor %78 : vector<1x256xf32>
    %80 = arith.fptosi %79 : vector<1x256xf32> to vector<1x256xi32>
    %c0_i32_22 = arith.constant 0 : i32
    %81 = vector.broadcast %c0_i32_22 : i32 to vector<1x256xi32>
    %82 = arith.cmpi sge, %80, %81 : vector<1x256xi32>
    %c16_i32_23 = arith.constant 16 : i32
    %83 = vector.broadcast %c16_i32_23 : i32 to vector<1x256xi32>
    %84 = arith.cmpi slt, %80, %83 : vector<1x256xi32>
    %85 = arith.andi %82, %84 : vector<1x256xi1>
    %86 = arith.extui %85 : vector<1x256xi1> to vector<1x256xi32>
    %87 = arith.sitofp %86 : vector<1x256xi32> to vector<1x256xf32>
    %88 = arith.mulf %43, %72 : vector<1x256xf32>
    %cst_24 = arith.constant 0.000000e+00 : f32
    %89 = vector.broadcast %cst_24 : f32 to vector<1x256xf32>
    %90 = arith.subf %89, %87 : vector<1x256xf32>
    %cst_25 = arith.constant 1.600000e+01 : f32
    %91 = vector.broadcast %cst_25 : f32 to vector<1x256xf32>
    %92 = arith.mulf %91, %32 : vector<1x256xf32>
    %cst_26 = arith.constant 5.000000e-01 : f32
    %93 = vector.broadcast %cst_26 : f32 to vector<1x256xf32>
    %94 = arith.subf %92, %93 : vector<1x256xf32>
    %95 = math.floor %94 : vector<1x256xf32>
    %96 = arith.fptosi %95 : vector<1x256xf32> to vector<1x256xi32>
    %c0_i32_27 = arith.constant 0 : i32
    %97 = vector.broadcast %c0_i32_27 : i32 to vector<1x256xi32>
    %98 = arith.cmpi sge, %96, %97 : vector<1x256xi32>
    %c16_i32_28 = arith.constant 16 : i32
    %99 = vector.broadcast %c16_i32_28 : i32 to vector<1x256xi32>
    %100 = arith.cmpi slt, %96, %99 : vector<1x256xi32>
    %101 = arith.andi %98, %100 : vector<1x256xi1>
    %102 = arith.extui %101 : vector<1x256xi1> to vector<1x256xi32>
    %103 = arith.sitofp %102 : vector<1x256xi32> to vector<1x256xf32>
    %cst_29 = arith.constant 1.600000e+01 : f32
    %104 = vector.broadcast %cst_29 : f32 to vector<1x256xf32>
    %105 = arith.mulf %104, %40 : vector<1x256xf32>
    %cst_30 = arith.constant 5.000000e-01 : f32
    %106 = vector.broadcast %cst_30 : f32 to vector<1x256xf32>
    %107 = arith.subf %105, %106 : vector<1x256xf32>
    %108 = math.floor %107 : vector<1x256xf32>
    %109 = arith.fptosi %108 : vector<1x256xf32> to vector<1x256xi32>
    %c0_i32_31 = arith.constant 0 : i32
    %110 = vector.broadcast %c0_i32_31 : i32 to vector<1x256xi32>
    %111 = arith.cmpi sge, %109, %110 : vector<1x256xi32>
    %c16_i32_32 = arith.constant 16 : i32
    %112 = vector.broadcast %c16_i32_32 : i32 to vector<1x256xi32>
    %113 = arith.cmpi slt, %109, %112 : vector<1x256xi32>
    %114 = arith.andi %111, %113 : vector<1x256xi1>
    %115 = arith.extui %114 : vector<1x256xi1> to vector<1x256xi32>
    %116 = arith.sitofp %115 : vector<1x256xi32> to vector<1x256xf32>
    %117 = vector.broadcast %34 : f32 to vector<1x256xf32>
    %118 = arith.subf %30, %117 : vector<1x256xf32>
    %cst_33 = arith.constant 1.600000e+01 : f32
    %119 = vector.broadcast %cst_33 : f32 to vector<1x256xf32>
    %120 = arith.mulf %119, %118 : vector<1x256xf32>
    %cst_34 = arith.constant 5.000000e-01 : f32
    %121 = vector.broadcast %cst_34 : f32 to vector<1x256xf32>
    %122 = arith.subf %120, %121 : vector<1x256xf32>
    %123 = math.floor %122 : vector<1x256xf32>
    %124 = arith.fptosi %123 : vector<1x256xf32> to vector<1x256xi32>
    %c0_i32_35 = arith.constant 0 : i32
    %125 = vector.broadcast %c0_i32_35 : i32 to vector<1x256xi32>
    %126 = arith.cmpi sge, %124, %125 : vector<1x256xi32>
    %c16_i32_36 = arith.constant 16 : i32
    %127 = vector.broadcast %c16_i32_36 : i32 to vector<1x256xi32>
    %128 = arith.cmpi slt, %124, %127 : vector<1x256xi32>
    %129 = arith.andi %126, %128 : vector<1x256xi1>
    %130 = arith.extui %129 : vector<1x256xi1> to vector<1x256xi32>
    %131 = arith.sitofp %130 : vector<1x256xi32> to vector<1x256xf32>
    %132 = arith.mulf %46, %116 : vector<1x256xf32>
    %cst_37 = arith.constant 0.000000e+00 : f32
    %133 = vector.broadcast %cst_37 : f32 to vector<1x256xf32>
    %134 = arith.subf %133, %131 : vector<1x256xf32>
    %135 = tpu.iota {dimensions = array<i32: 0>} : vector<128x256xi32>
    %136 = tpu.iota {dimensions = array<i32: 0>} : vector<16x256xi32>
    %137 = vector.broadcast %96 : vector<1x256xi32> to vector<128x256xi32>
    %138 = arith.cmpi eq, %135, %137 : vector<128x256xi32>
    %cst_38 = arith.constant 0.000000e+00 : f32
    %139 = vector.shape_cast %103 : vector<1x256xf32> to vector<1x256xf32>
    %140 = vector.broadcast %139 : vector<1x256xf32> to vector<128x256xf32>
    %141 = vector.broadcast %cst_38 : f32 to vector<128x256xf32>
    %142 = arith.select %138, %140, %141 : vector<128x256xi1>, vector<128x256xf32>
    %143 = vector.broadcast %109 : vector<1x256xi32> to vector<128x256xi32>
    %144 = arith.cmpi eq, %135, %143 : vector<128x256xi32>
    %cst_39 = arith.constant 0.000000e+00 : f32
    %145 = vector.shape_cast %132 : vector<1x256xf32> to vector<1x256xf32>
    %146 = vector.broadcast %145 : vector<1x256xf32> to vector<128x256xf32>
    %147 = vector.broadcast %cst_39 : f32 to vector<128x256xf32>
    %148 = arith.select %144, %146, %147 : vector<128x256xi1>, vector<128x256xf32>
    %149 = arith.addf %142, %148 : vector<128x256xf32>
    %150 = vector.broadcast %124 : vector<1x256xi32> to vector<128x256xi32>
    %151 = arith.cmpi eq, %135, %150 : vector<128x256xi32>
    %cst_40 = arith.constant 0.000000e+00 : f32
    %152 = vector.shape_cast %134 : vector<1x256xf32> to vector<1x256xf32>
    %153 = vector.broadcast %152 : vector<1x256xf32> to vector<128x256xf32>
    %154 = vector.broadcast %cst_40 : f32 to vector<128x256xf32>
    %155 = arith.select %151, %153, %154 : vector<128x256xi1>, vector<128x256xf32>
    %156 = arith.addf %149, %155 : vector<128x256xf32>
    %c0_41 = arith.constant 0 : index
    %c0_42 = arith.constant 0 : index
    %157 = vector.load %arg2[%c0_41, %c0_42] : memref<128x128xf32, #tpu.memory_space<vmem>>, vector<128x128xf32>
    %c0_i32_43 = arith.constant 0 : i32
    %158 = vector.broadcast %c0_i32_43 : i32 to vector<1x256xi32>
    %159 = arith.subi %52, %158 : vector<1x256xi32>
    %160 = vector.broadcast %159 : vector<1x256xi32> to vector<16x256xi32>
    %161 = arith.cmpi eq, %136, %160 : vector<16x256xi32>
    %cst_44 = arith.constant 0.000000e+00 : f32
    %162 = vector.shape_cast %59 : vector<1x256xf32> to vector<1x256xf32>
    %163 = vector.broadcast %162 : vector<1x256xf32> to vector<16x256xf32>
    %164 = vector.broadcast %cst_44 : f32 to vector<16x256xf32>
    %165 = arith.select %161, %163, %164 : vector<16x256xi1>, vector<16x256xf32>
    %c0_i32_45 = arith.constant 0 : i32
    %166 = vector.broadcast %c0_i32_45 : i32 to vector<1x256xi32>
    %167 = arith.subi %65, %166 : vector<1x256xi32>
    %168 = vector.broadcast %167 : vector<1x256xi32> to vector<16x256xi32>
    %169 = arith.cmpi eq, %136, %168 : vector<16x256xi32>
    %cst_46 = arith.constant 0.000000e+00 : f32
    %170 = vector.shape_cast %88 : vector<1x256xf32> to vector<1x256xf32>
    %171 = vector.broadcast %170 : vector<1x256xf32> to vector<16x256xf32>
    %172 = vector.broadcast %cst_46 : f32 to vector<16x256xf32>
    %173 = arith.select %169, %171, %172 : vector<16x256xi1>, vector<16x256xf32>
    %174 = arith.addf %165, %173 : vector<16x256xf32>
    %c0_i32_47 = arith.constant 0 : i32
    %175 = vector.broadcast %c0_i32_47 : i32 to vector<1x256xi32>
    %176 = arith.subi %80, %175 : vector<1x256xi32>
    %177 = vector.broadcast %176 : vector<1x256xi32> to vector<16x256xi32>
    %178 = arith.cmpi eq, %136, %177 : vector<16x256xi32>
    %cst_48 = arith.constant 0.000000e+00 : f32
    %179 = vector.shape_cast %90 : vector<1x256xf32> to vector<1x256xf32>
    %180 = vector.broadcast %179 : vector<1x256xf32> to vector<16x256xf32>
    %181 = vector.broadcast %cst_48 : f32 to vector<16x256xf32>
    %182 = arith.select %178, %180, %181 : vector<16x256xi1>, vector<16x256xf32>
    %183 = arith.addf %174, %182 : vector<16x256xf32>
    %cst_49 = arith.constant dense<0.000000e+00> : vector<128x256xf32>
    %184 = tpu.matmul %157, %156, %cst_49 {dimension_numbers = #tpu.dot_dimension_numbers<[1], [0], [0], [1], [0, 0, 1, 1], [], []>} : vector<128x128xf32>, vector<128x256xf32>, vector<128x256xf32> -> vector<128x256xf32>
    %cst_50 = arith.constant 0.000000e+00 : f32
    %185 = vector.broadcast %cst_50 : f32 to vector<8x256xf32>
    %186 = vector.extract_strided_slice %184 {offsets = [0, 0], sizes = [8, 256], strides = [1, 1]} : vector<128x256xf32> to vector<8x256xf32>
    %187 = vector.extract_strided_slice %183 {offsets = [0, 0], sizes = [1, 256], strides = [1, 1]} : vector<16x256xf32> to vector<1x256xf32>
    %188 = vector.broadcast %187 : vector<1x256xf32> to vector<8x256xf32>
    %189 = arith.mulf %186, %188 : vector<8x256xf32>
    %190 = arith.addf %185, %189 : vector<8x256xf32>
    %191 = vector.extract_strided_slice %184 {offsets = [8, 0], sizes = [8, 256], strides = [1, 1]} : vector<128x256xf32> to vector<8x256xf32>
    %192 = vector.extract_strided_slice %183 {offsets = [1, 0], sizes = [1, 256], strides = [1, 1]} : vector<16x256xf32> to vector<1x256xf32>
    %193 = vector.broadcast %192 : vector<1x256xf32> to vector<8x256xf32>
    %194 = arith.mulf %191, %193 : vector<8x256xf32>
    %195 = arith.addf %190, %194 : vector<8x256xf32>
    %196 = vector.extract_strided_slice %184 {offsets = [16, 0], sizes = [8, 256], strides = [1, 1]} : vector<128x256xf32> to vector<8x256xf32>
    %197 = vector.extract_strided_slice %183 {offsets = [2, 0], sizes = [1, 256], strides = [1, 1]} : vector<16x256xf32> to vector<1x256xf32>
    %198 = vector.broadcast %197 : vector<1x256xf32> to vector<8x256xf32>
    %199 = arith.mulf %196, %198 : vector<8x256xf32>
    %200 = arith.addf %195, %199 : vector<8x256xf32>
    %201 = vector.extract_strided_slice %184 {offsets = [24, 0], sizes = [8, 256], strides = [1, 1]} : vector<128x256xf32> to vector<8x256xf32>
    %202 = vector.extract_strided_slice %183 {offsets = [3, 0], sizes = [1, 256], strides = [1, 1]} : vector<16x256xf32> to vector<1x256xf32>
    %203 = vector.broadcast %202 : vector<1x256xf32> to vector<8x256xf32>
    %204 = arith.mulf %201, %203 : vector<8x256xf32>
    %205 = arith.addf %200, %204 : vector<8x256xf32>
    %206 = vector.extract_strided_slice %184 {offsets = [32, 0], sizes = [8, 256], strides = [1, 1]} : vector<128x256xf32> to vector<8x256xf32>
    %207 = vector.extract_strided_slice %183 {offsets = [4, 0], sizes = [1, 256], strides = [1, 1]} : vector<16x256xf32> to vector<1x256xf32>
    %208 = vector.broadcast %207 : vector<1x256xf32> to vector<8x256xf32>
    %209 = arith.mulf %206, %208 : vector<8x256xf32>
    %210 = arith.addf %205, %209 : vector<8x256xf32>
    %211 = vector.extract_strided_slice %184 {offsets = [40, 0], sizes = [8, 256], strides = [1, 1]} : vector<128x256xf32> to vector<8x256xf32>
    %212 = vector.extract_strided_slice %183 {offsets = [5, 0], sizes = [1, 256], strides = [1, 1]} : vector<16x256xf32> to vector<1x256xf32>
    %213 = vector.broadcast %212 : vector<1x256xf32> to vector<8x256xf32>
    %214 = arith.mulf %211, %213 : vector<8x256xf32>
    %215 = arith.addf %210, %214 : vector<8x256xf32>
    %216 = vector.extract_strided_slice %184 {offsets = [48, 0], sizes = [8, 256], strides = [1, 1]} : vector<128x256xf32> to vector<8x256xf32>
    %217 = vector.extract_strided_slice %183 {offsets = [6, 0], sizes = [1, 256], strides = [1, 1]} : vector<16x256xf32> to vector<1x256xf32>
    %218 = vector.broadcast %217 : vector<1x256xf32> to vector<8x256xf32>
    %219 = arith.mulf %216, %218 : vector<8x256xf32>
    %220 = arith.addf %215, %219 : vector<8x256xf32>
    %221 = vector.extract_strided_slice %184 {offsets = [56, 0], sizes = [8, 256], strides = [1, 1]} : vector<128x256xf32> to vector<8x256xf32>
    %222 = vector.extract_strided_slice %183 {offsets = [7, 0], sizes = [1, 256], strides = [1, 1]} : vector<16x256xf32> to vector<1x256xf32>
    %223 = vector.broadcast %222 : vector<1x256xf32> to vector<8x256xf32>
    %224 = arith.mulf %221, %223 : vector<8x256xf32>
    %225 = arith.addf %220, %224 : vector<8x256xf32>
    %226 = vector.extract_strided_slice %184 {offsets = [64, 0], sizes = [8, 256], strides = [1, 1]} : vector<128x256xf32> to vector<8x256xf32>
    %227 = vector.extract_strided_slice %183 {offsets = [8, 0], sizes = [1, 256], strides = [1, 1]} : vector<16x256xf32> to vector<1x256xf32>
    %228 = vector.broadcast %227 : vector<1x256xf32> to vector<8x256xf32>
    %229 = arith.mulf %226, %228 : vector<8x256xf32>
    %230 = arith.addf %225, %229 : vector<8x256xf32>
    %231 = vector.extract_strided_slice %184 {offsets = [72, 0], sizes = [8, 256], strides = [1, 1]} : vector<128x256xf32> to vector<8x256xf32>
    %232 = vector.extract_strided_slice %183 {offsets = [9, 0], sizes = [1, 256], strides = [1, 1]} : vector<16x256xf32> to vector<1x256xf32>
    %233 = vector.broadcast %232 : vector<1x256xf32> to vector<8x256xf32>
    %234 = arith.mulf %231, %233 : vector<8x256xf32>
    %235 = arith.addf %230, %234 : vector<8x256xf32>
    %236 = vector.extract_strided_slice %184 {offsets = [80, 0], sizes = [8, 256], strides = [1, 1]} : vector<128x256xf32> to vector<8x256xf32>
    %237 = vector.extract_strided_slice %183 {offsets = [10, 0], sizes = [1, 256], strides = [1, 1]} : vector<16x256xf32> to vector<1x256xf32>
    %238 = vector.broadcast %237 : vector<1x256xf32> to vector<8x256xf32>
    %239 = arith.mulf %236, %238 : vector<8x256xf32>
    %240 = arith.addf %235, %239 : vector<8x256xf32>
    %241 = vector.extract_strided_slice %184 {offsets = [88, 0], sizes = [8, 256], strides = [1, 1]} : vector<128x256xf32> to vector<8x256xf32>
    %242 = vector.extract_strided_slice %183 {offsets = [11, 0], sizes = [1, 256], strides = [1, 1]} : vector<16x256xf32> to vector<1x256xf32>
    %243 = vector.broadcast %242 : vector<1x256xf32> to vector<8x256xf32>
    %244 = arith.mulf %241, %243 : vector<8x256xf32>
    %245 = arith.addf %240, %244 : vector<8x256xf32>
    %246 = vector.extract_strided_slice %184 {offsets = [96, 0], sizes = [8, 256], strides = [1, 1]} : vector<128x256xf32> to vector<8x256xf32>
    %247 = vector.extract_strided_slice %183 {offsets = [12, 0], sizes = [1, 256], strides = [1, 1]} : vector<16x256xf32> to vector<1x256xf32>
    %248 = vector.broadcast %247 : vector<1x256xf32> to vector<8x256xf32>
    %249 = arith.mulf %246, %248 : vector<8x256xf32>
    %250 = arith.addf %245, %249 : vector<8x256xf32>
    %251 = vector.extract_strided_slice %184 {offsets = [104, 0], sizes = [8, 256], strides = [1, 1]} : vector<128x256xf32> to vector<8x256xf32>
    %252 = vector.extract_strided_slice %183 {offsets = [13, 0], sizes = [1, 256], strides = [1, 1]} : vector<16x256xf32> to vector<1x256xf32>
    %253 = vector.broadcast %252 : vector<1x256xf32> to vector<8x256xf32>
    %254 = arith.mulf %251, %253 : vector<8x256xf32>
    %255 = arith.addf %250, %254 : vector<8x256xf32>
    %256 = vector.extract_strided_slice %184 {offsets = [112, 0], sizes = [8, 256], strides = [1, 1]} : vector<128x256xf32> to vector<8x256xf32>
    %257 = vector.extract_strided_slice %183 {offsets = [14, 0], sizes = [1, 256], strides = [1, 1]} : vector<16x256xf32> to vector<1x256xf32>
    %258 = vector.broadcast %257 : vector<1x256xf32> to vector<8x256xf32>
    %259 = arith.mulf %256, %258 : vector<8x256xf32>
    %260 = arith.addf %255, %259 : vector<8x256xf32>
    %261 = vector.extract_strided_slice %184 {offsets = [120, 0], sizes = [8, 256], strides = [1, 1]} : vector<128x256xf32> to vector<8x256xf32>
    %262 = vector.extract_strided_slice %183 {offsets = [15, 0], sizes = [1, 256], strides = [1, 1]} : vector<16x256xf32> to vector<1x256xf32>
    %263 = vector.broadcast %262 : vector<1x256xf32> to vector<8x256xf32>
    %264 = arith.mulf %261, %263 : vector<8x256xf32>
    %265 = arith.addf %260, %264 : vector<8x256xf32>
    %c0_51 = arith.constant 0 : index
    %c0_52 = arith.constant 0 : index
    %266 = vector.load %arg3[%c0_51, %c0_52] : memref<8x256xf32, #tpu.memory_space<vmem>>, vector<8x256xf32>
    tpu.vector_store %arg3[%c0_51, %c0_52], %265 {strides = array<i32>} : memref<8x256xf32, #tpu.memory_space<vmem>>, vector<8x256xf32>,
    return
  }
  func.func @transform_0(%arg0: i32) -> (i32, i32) {
    %c0_i32 = arith.constant 0 : i32
    %c0_i32_0 = arith.constant 0 : i32
    return %c0_i32, %arg0 : i32, i32
  }
  func.func @transform_1(%arg0: i32) -> (i32, i32) {
    %c0_i32 = arith.constant 0 : i32
    %c0_i32_0 = arith.constant 0 : i32
    %c0_i32_1 = arith.constant 0 : i32
    return %c0_i32, %c0_i32_0 : i32, i32
  }
  func.func @transform_2(%arg0: i32) -> (i32, i32) {
    %c0_i32 = arith.constant 0 : i32
    %c0_i32_0 = arith.constant 0 : i32
    return %c0_i32, %arg0 : i32, i32
  }
}

module attributes {stable_mosaic.version = 11 : i64} {
  func.func @sat_query_kernel(%arg0: i32, %arg1: memref<4x256xf32, #tpu.memory_space<vmem>>, %arg2: memref<128x128xf32, #tpu.memory_space<vmem>>, %arg3: memref<8x256xf32, #tpu.memory_space<vmem>>) attributes {dimension_semantics = [#tpu.dimension_semantics<parallel>], iteration_bounds = array<i64: 1>, scalar_prefetch = 0 : i64, scratch_operands = 0 : i64, tpu.core_type = #tpu.core_type<tc>, window_params = [{transform_indices = @transform_0, window_bounds = array<i64: 4, 256>}, {pipeline_mode = #tpu.pipeline_mode<synchronous>, transform_indices = @transform_1, window_bounds = array<i64: 128, 128>}, {transform_indices = @transform_2, window_bounds = array<i64: 8, 256>}]} {
    %c0 = arith.constant 0 : index
    %c0_0 = arith.constant 0 : index
    %0 = vector.load %arg1[%c0, %c0_0] : memref<4x256xf32, #tpu.memory_space<vmem>>, vector<4x256xf32>
    %1 = vector.extract_strided_slice %0 {offsets = [0, 0], sizes = [1, 256], strides = [1, 1]} : vector<4x256xf32> to vector<1x256xf32>
    %2 = vector.extract_strided_slice %0 {offsets = [1, 0], sizes = [1, 256], strides = [1, 1]} : vector<4x256xf32> to vector<1x256xf32>
    %3 = vector.extract_strided_slice %0 {offsets = [2, 0], sizes = [1, 256], strides = [1, 1]} : vector<4x256xf32> to vector<1x256xf32>
    %4 = vector.extract_strided_slice %0 {offsets = [3, 0], sizes = [1, 256], strides = [1, 1]} : vector<4x256xf32> to vector<1x256xf32>
    %cst = arith.constant 5.000000e-01 : f32
    %5 = vector.broadcast %cst : f32 to vector<1x256xf32>
    %6 = arith.mulf %3, %5 : vector<1x256xf32>
    %7 = arith.subf %1, %6 : vector<1x256xf32>
    %cst_1 = arith.constant 5.000000e-01 : f32
    %8 = vector.broadcast %cst_1 : f32 to vector<1x256xf32>
    %9 = arith.mulf %3, %8 : vector<1x256xf32>
    %10 = arith.addf %1, %9 : vector<1x256xf32>
    %cst_2 = arith.constant 5.000000e-01 : f32
    %11 = vector.broadcast %cst_2 : f32 to vector<1x256xf32>
    %12 = arith.mulf %4, %11 : vector<1x256xf32>
    %13 = arith.subf %2, %12 : vector<1x256xf32>
    %cst_3 = arith.constant 5.000000e-01 : f32
    %14 = vector.broadcast %cst_3 : f32 to vector<1x256xf32>
    %15 = arith.mulf %4, %14 : vector<1x256xf32>
    %16 = arith.addf %2, %15 : vector<1x256xf32>
    %cst_4 = arith.constant 0.000000e+00 : f32
    %17 = vector.broadcast %cst_4 : f32 to vector<1x256xf32>
    %18 = arith.cmpf olt, %3, %17 : vector<1x256xf32>
    %19 = arith.select %18, %10, %7 : vector<1x256xi1>, vector<1x256xf32>
    %20 = arith.select %18, %7, %10 : vector<1x256xi1>, vector<1x256xf32>
    %cst_5 = arith.constant 0.000000e+00 : f32
    %21 = vector.broadcast %cst_5 : f32 to vector<1x256xf32>
    %22 = arith.cmpf olt, %4, %21 : vector<1x256xf32>
    %23 = arith.select %22, %16, %13 : vector<1x256xi1>, vector<1x256xf32>
    %24 = arith.select %22, %13, %16 : vector<1x256xi1>, vector<1x256xf32>
    %25 = math.floor %19 : vector<1x256xf32>
    %26 = arith.subf %19, %25 : vector<1x256xf32>
    %27 = math.floor %20 : vector<1x256xf32>
    %28 = arith.subf %20, %27 : vector<1x256xf32>
    %29 = math.floor %23 : vector<1x256xf32>
    %30 = arith.subf %23, %29 : vector<1x256xf32>
    %31 = math.floor %24 : vector<1x256xf32>
    %32 = arith.subf %24, %31 : vector<1x256xf32>
    %cst_6 = arith.constant 1.000000e+00 : f32
    %cst_7 = arith.constant 1.600000e+01 : f32
    %33 = arith.divf %cst_6, %cst_7 : f32
    %cst_8 = arith.constant 1.000000e+00 : f32
    %cst_9 = arith.constant 1.600000e+01 : f32
    %34 = arith.divf %cst_8, %cst_9 : f32
    %cst_10 = arith.constant 5.000000e-01 : f32
    %35 = arith.mulf %33, %cst_10 : f32
    %cst_11 = arith.constant 1.000000e+00 : f32
    %36 = arith.subf %cst_11, %35 : f32
    %37 = vector.broadcast %36 : f32 to vector<1x256xf32>
    %cst_12 = arith.constant 5.000000e-01 : f32
    %38 = arith.mulf %34, %cst_12 : f32
    %cst_13 = arith.constant 1.000000e+00 : f32
    %39 = arith.subf %cst_13, %38 : f32
    %40 = vector.broadcast %39 : f32 to vector<1x256xf32>
    %41 = arith.cmpf ogt, %26, %28 : vector<1x256xf32>
    %42 = arith.extui %41 : vector<1x256xi1> to vector<1x256xi32>
    %43 = arith.sitofp %42 : vector<1x256xi32> to vector<1x256xf32>
    %44 = arith.cmpf ogt, %30, %32 : vector<1x256xf32>
    %45 = arith.extui %44 : vector<1x256xi1> to vector<1x256xi32>
    %46 = arith.sitofp %45 : vector<1x256xi32> to vector<1x256xf32>
    %cst_14 = arith.constant 1.600000e+01 : f32
    %47 = vector.broadcast %cst_14 : f32 to vector<1x256xf32>
    %48 = arith.mulf %47, %28 : vector<1x256xf32>
    %cst_15 = arith.constant 5.000000e-01 : f32
    %49 = vector.broadcast %cst_15 : f32 to vector<1x256xf32>
    %50 = arith.subf %48, %49 : vector<1x256xf32>
    %51 = math.floor %50 : vector<1x256xf32>
    %52 = arith.fptosi %51 : vector<1x256xf32> to vector<1x256xi32>
    %c0_i32 = arith.constant 0 : i32
    %53 = vector.broadcast %c0_i32 : i32 to vector<1x256xi32>
    %54 = arith.cmpi sge, %52, %53 : vector<1x256xi32>
    %c16_i32 = arith.constant 16 : i32
    %55 = vector.broadcast %c16_i32 : i32 to vector<1x256xi32>
    %56 = arith.cmpi slt, %52, %55 : vector<1x256xi32>
    %57 = arith.andi %54, %56 : vector<1x256xi1>
    %58 = arith.extui %57 : vector<1x256xi1> to vector<1x256xi32>
    %59 = arith.sitofp %58 : vector<1x256xi32> to vector<1x256xf32>
    %cst_16 = arith.constant 1.600000e+01 : f32
    %60 = vector.broadcast %cst_16 : f32 to vector<1x256xf32>
    %61 = arith.mulf %60, %37 : vector<1x256xf32>
    %cst_17 = arith.constant 5.000000e-01 : f32
    %62 = vector.broadcast %cst_17 : f32 to vector<1x256xf32>
    %63 = arith.subf %61, %62 : vector<1x256xf32>
    %64 = math.floor %63 : vector<1x256xf32>
    %65 = arith.fptosi %64 : vector<1x256xf32> to vector<1x256xi32>
    %c0_i32_18 = arith.constant 0 : i32
    %66 = vector.broadcast %c0_i32_18 : i32 to vector<1x256xi32>
    %67 = arith.cmpi sge, %65, %66 : vector<1x256xi32>
    %c16_i32_19 = arith.constant 16 : i32
    %68 = vector.broadcast %c16_i32_19 : i32 to vector<1x256xi32>
    %69 = arith.cmpi slt, %65, %68 : vector<1x256xi32>
    %70 = arith.andi %67, %69 : vector<1x256xi1>
    %71 = arith.extui %70 : vector<1x256xi1> to vector<1x256xi32>
    %72 = arith.sitofp %71 : vector<1x256xi32> to vector<1x256xf32>
    %73 = vector.broadcast %33 : f32 to vector<1x256xf32>
    %74 = arith.subf %26, %73 : vector<1x256xf32>
    %cst_20 = arith.constant 1.600000e+01 : f32
    %75 = vector.broadcast %cst_20 : f32 to vector<1x256xf32>
    %76 = arith.mulf %75, %74 : vector<1x256xf32>
    %cst_21 = arith.constant 5.000000e-01 : f32
    %77 = vector.broadcast %cst_21 : f32 to vector<1x256xf32>
    %78 = arith.subf %76, %77 : vector<1x256xf32>
    %79 = math.floor %78 : vector<1x256xf32>
    %80 = arith.fptosi %79 : vector<1x256xf32> to vector<1x256xi32>
    %c0_i32_22 = arith.constant 0 : i32
    %81 = vector.broadcast %c0_i32_22 : i32 to vector<1x256xi32>
    %82 = arith.cmpi sge, %80, %81 : vector<1x256xi32>
    %c16_i32_23 = arith.constant 16 : i32
    %83 = vector.broadcast %c16_i32_23 : i32 to vector<1x256xi32>
    %84 = arith.cmpi slt, %80, %83 : vector<1x256xi32>
    %85 = arith.andi %82, %84 : vector<1x256xi1>
    %86 = arith.extui %85 : vector<1x256xi1> to vector<1x256xi32>
    %87 = arith.sitofp %86 : vector<1x256xi32> to vector<1x256xf32>
    %88 = arith.mulf %43, %72 : vector<1x256xf32>
    %cst_24 = arith.constant 0.000000e+00 : f32
    %89 = vector.broadcast %cst_24 : f32 to vector<1x256xf32>
    %90 = arith.subf %89, %87 : vector<1x256xf32>
    %cst_25 = arith.constant 1.600000e+01 : f32
    %91 = vector.broadcast %cst_25 : f32 to vector<1x256xf32>
    %92 = arith.mulf %91, %32 : vector<1x256xf32>
    %cst_26 = arith.constant 5.000000e-01 : f32
    %93 = vector.broadcast %cst_26 : f32 to vector<1x256xf32>
    %94 = arith.subf %92, %93 : vector<1x256xf32>
    %95 = math.floor %94 : vector<1x256xf32>
    %96 = arith.fptosi %95 : vector<1x256xf32> to vector<1x256xi32>
    %c0_i32_27 = arith.constant 0 : i32
    %97 = vector.broadcast %c0_i32_27 : i32 to vector<1x256xi32>
    %98 = arith.cmpi sge, %96, %97 : vector<1x256xi32>
    %c16_i32_28 = arith.constant 16 : i32
    %99 = vector.broadcast %c16_i32_28 : i32 to vector<1x256xi32>
    %100 = arith.cmpi slt, %96, %99 : vector<1x256xi32>
    %101 = arith.andi %98, %100 : vector<1x256xi1>
    %102 = arith.extui %101 : vector<1x256xi1> to vector<1x256xi32>
    %103 = arith.sitofp %102 : vector<1x256xi32> to vector<1x256xf32>
    %cst_29 = arith.constant 1.600000e+01 : f32
    %104 = vector.broadcast %cst_29 : f32 to vector<1x256xf32>
    %105 = arith.mulf %104, %40 : vector<1x256xf32>
    %cst_30 = arith.constant 5.000000e-01 : f32
    %106 = vector.broadcast %cst_30 : f32 to vector<1x256xf32>
    %107 = arith.subf %105, %106 : vector<1x256xf32>
    %108 = math.floor %107 : vector<1x256xf32>
    %109 = arith.fptosi %108 : vector<1x256xf32> to vector<1x256xi32>
    %c0_i32_31 = arith.constant 0 : i32
    %110 = vector.broadcast %c0_i32_31 : i32 to vector<1x256xi32>
    %111 = arith.cmpi sge, %109, %110 : vector<1x256xi32>
    %c16_i32_32 = arith.constant 16 : i32
    %112 = vector.broadcast %c16_i32_32 : i32 to vector<1x256xi32>
    %113 = arith.cmpi slt, %109, %112 : vector<1x256xi32>
    %114 = arith.andi %111, %113 : vector<1x256xi1>
    %115 = arith.extui %114 : vector<1x256xi1> to vector<1x256xi32>
    %116 = arith.sitofp %115 : vector<1x256xi32> to vector<1x256xf32>
    %117 = vector.broadcast %34 : f32 to vector<1x256xf32>
    %118 = arith.subf %30, %117 : vector<1x256xf32>
    %cst_33 = arith.constant 1.600000e+01 : f32
    %119 = vector.broadcast %cst_33 : f32 to vector<1x256xf32>
    %120 = arith.mulf %119, %118 : vector<1x256xf32>
    %cst_34 = arith.constant 5.000000e-01 : f32
    %121 = vector.broadcast %cst_34 : f32 to vector<1x256xf32>
    %122 = arith.subf %120, %121 : vector<1x256xf32>
    %123 = math.floor %122 : vector<1x256xf32>
    %124 = arith.fptosi %123 : vector<1x256xf32> to vector<1x256xi32>
    %c0_i32_35 = arith.constant 0 : i32
    %125 = vector.broadcast %c0_i32_35 : i32 to vector<1x256xi32>
    %126 = arith.cmpi sge, %124, %125 : vector<1x256xi32>
    %c16_i32_36 = arith.constant 16 : i32
    %127 = vector.broadcast %c16_i32_36 : i32 to vector<1x256xi32>
    %128 = arith.cmpi slt, %124, %127 : vector<1x256xi32>
    %129 = arith.andi %126, %128 : vector<1x256xi1>
    %130 = arith.extui %129 : vector<1x256xi1> to vector<1x256xi32>
    %131 = arith.sitofp %130 : vector<1x256xi32> to vector<1x256xf32>
    %132 = arith.mulf %46, %116 : vector<1x256xf32>
    %cst_37 = arith.constant 0.000000e+00 : f32
    %133 = vector.broadcast %cst_37 : f32 to vector<1x256xf32>
    %134 = arith.subf %133, %131 : vector<1x256xf32>
    %135 = tpu.iota {dimensions = array<i32: 0>} : vector<128x256xi32>
    %136 = tpu.iota {dimensions = array<i32: 0>} : vector<16x256xi32>
    %137 = vector.broadcast %96 : vector<1x256xi32> to vector<128x256xi32>
    %138 = arith.cmpi eq, %135, %137 : vector<128x256xi32>
    %cst_38 = arith.constant 0.000000e+00 : f32
    %139 = vector.shape_cast %103 : vector<1x256xf32> to vector<1x256xf32>
    %140 = vector.broadcast %139 : vector<1x256xf32> to vector<128x256xf32>
    %141 = vector.broadcast %cst_38 : f32 to vector<128x256xf32>
    %142 = arith.select %138, %140, %141 : vector<128x256xi1>, vector<128x256xf32>
    %143 = vector.broadcast %109 : vector<1x256xi32> to vector<128x256xi32>
    %144 = arith.cmpi eq, %135, %143 : vector<128x256xi32>
    %cst_39 = arith.constant 0.000000e+00 : f32
    %145 = vector.shape_cast %132 : vector<1x256xf32> to vector<1x256xf32>
    %146 = vector.broadcast %145 : vector<1x256xf32> to vector<128x256xf32>
    %147 = vector.broadcast %cst_39 : f32 to vector<128x256xf32>
    %148 = arith.select %144, %146, %147 : vector<128x256xi1>, vector<128x256xf32>
    %149 = arith.addf %142, %148 : vector<128x256xf32>
    %150 = vector.broadcast %124 : vector<1x256xi32> to vector<128x256xi32>
    %151 = arith.cmpi eq, %135, %150 : vector<128x256xi32>
    %cst_40 = arith.constant 0.000000e+00 : f32
    %152 = vector.shape_cast %134 : vector<1x256xf32> to vector<1x256xf32>
    %153 = vector.broadcast %152 : vector<1x256xf32> to vector<128x256xf32>
    %154 = vector.broadcast %cst_40 : f32 to vector<128x256xf32>
    %155 = arith.select %151, %153, %154 : vector<128x256xi1>, vector<128x256xf32>
    %156 = arith.addf %149, %155 : vector<128x256xf32>
    %c0_41 = arith.constant 0 : index
    %c0_42 = arith.constant 0 : index
    %157 = vector.load %arg2[%c0_41, %c0_42] : memref<128x128xf32, #tpu.memory_space<vmem>>, vector<128x128xf32>
    %c0_i32_43 = arith.constant 0 : i32
    %158 = vector.broadcast %c0_i32_43 : i32 to vector<1x256xi32>
    %159 = arith.subi %52, %158 : vector<1x256xi32>
    %160 = vector.broadcast %159 : vector<1x256xi32> to vector<16x256xi32>
    %161 = arith.cmpi eq, %136, %160 : vector<16x256xi32>
    %cst_44 = arith.constant 0.000000e+00 : f32
    %162 = vector.shape_cast %59 : vector<1x256xf32> to vector<1x256xf32>
    %163 = vector.broadcast %162 : vector<1x256xf32> to vector<16x256xf32>
    %164 = vector.broadcast %cst_44 : f32 to vector<16x256xf32>
    %165 = arith.select %161, %163, %164 : vector<16x256xi1>, vector<16x256xf32>
    %c0_i32_45 = arith.constant 0 : i32
    %166 = vector.broadcast %c0_i32_45 : i32 to vector<1x256xi32>
    %167 = arith.subi %65, %166 : vector<1x256xi32>
    %168 = vector.broadcast %167 : vector<1x256xi32> to vector<16x256xi32>
    %169 = arith.cmpi eq, %136, %168 : vector<16x256xi32>
    %cst_46 = arith.constant 0.000000e+00 : f32
    %170 = vector.shape_cast %88 : vector<1x256xf32> to vector<1x256xf32>
    %171 = vector.broadcast %170 : vector<1x256xf32> to vector<16x256xf32>
    %172 = vector.broadcast %cst_46 : f32 to vector<16x256xf32>
    %173 = arith.select %169, %171, %172 : vector<16x256xi1>, vector<16x256xf32>
    %174 = arith.addf %165, %173 : vector<16x256xf32>
    %c0_i32_47 = arith.constant 0 : i32
    %175 = vector.broadcast %c0_i32_47 : i32 to vector<1x256xi32>
    %176 = arith.subi %80, %175 : vector<1x256xi32>
    %177 = vector.broadcast %176 : vector<1x256xi32> to vector<16x256xi32>
    %178 = arith.cmpi eq, %136, %177 : vector<16x256xi32>
    %cst_48 = arith.constant 0.000000e+00 : f32
    %179 = vector.shape_cast %90 : vector<1x256xf32> to vector<1x256xf32>
    %180 = vector.broadcast %179 : vector<1x256xf32> to vector<16x256xf32>
    %181 = vector.broadcast %cst_48 : f32 to vector<16x256xf32>
    %182 = arith.select %178, %180, %181 : vector<16x256xi1>, vector<16x256xf32>
    %183 = arith.addf %174, %182 : vector<16x256xf32>
    %cst_49 = arith.constant dense<0.000000e+00> : vector<128x256xf32>
    %184 = tpu.matmul %157, %156, %cst_49 {dimension_numbers = #tpu.dot_dimension_numbers<[1], [0], [0], [1], [0, 0, 1, 1], [], []>} : vector<128x128xf32>, vector<128x256xf32>, vector<128x256xf32> -> vector<128x256xf32>
    %cst_50 = arith.constant 0.000000e+00 : f32
    %185 = vector.broadcast %cst_50 : f32 to vector<8x256xf32>
    %186 = vector.extract_strided_slice %184 {offsets = [0, 0], sizes = [8, 256], strides = [1, 1]} : vector<128x256xf32> to vector<8x256xf32>
    %187 = vector.extract_strided_slice %183 {offsets = [0, 0], sizes = [1, 256], strides = [1, 1]} : vector<16x256xf32> to vector<1x256xf32>
    %188 = vector.broadcast %187 : vector<1x256xf32> to vector<8x256xf32>
    %189 = arith.mulf %186, %188 : vector<8x256xf32>
    %190 = arith.addf %185, %189 : vector<8x256xf32>
    %191 = vector.extract_strided_slice %184 {offsets = [8, 0], sizes = [8, 256], strides = [1, 1]} : vector<128x256xf32> to vector<8x256xf32>
    %192 = vector.extract_strided_slice %183 {offsets = [1, 0], sizes = [1, 256], strides = [1, 1]} : vector<16x256xf32> to vector<1x256xf32>
    %193 = vector.broadcast %192 : vector<1x256xf32> to vector<8x256xf32>
    %194 = arith.mulf %191, %193 : vector<8x256xf32>
    %195 = arith.addf %190, %194 : vector<8x256xf32>
    %196 = vector.extract_strided_slice %184 {offsets = [16, 0], sizes = [8, 256], strides = [1, 1]} : vector<128x256xf32> to vector<8x256xf32>
    %197 = vector.extract_strided_slice %183 {offsets = [2, 0], sizes = [1, 256], strides = [1, 1]} : vector<16x256xf32> to vector<1x256xf32>
    %198 = vector.broadcast %197 : vector<1x256xf32> to vector<8x256xf32>
    %199 = arith.mulf %196, %198 : vector<8x256xf32>
    %200 = arith.addf %195, %199 : vector<8x256xf32>
    %201 = vector.extract_strided_slice %184 {offsets = [24, 0], sizes = [8, 256], strides = [1, 1]} : vector<128x256xf32> to vector<8x256xf32>
    %202 = vector.extract_strided_slice %183 {offsets = [3, 0], sizes = [1, 256], strides = [1, 1]} : vector<16x256xf32> to vector<1x256xf32>
    %203 = vector.broadcast %202 : vector<1x256xf32> to vector<8x256xf32>
    %204 = arith.mulf %201, %203 : vector<8x256xf32>
    %205 = arith.addf %200, %204 : vector<8x256xf32>
    %206 = vector.extract_strided_slice %184 {offsets = [32, 0], sizes = [8, 256], strides = [1, 1]} : vector<128x256xf32> to vector<8x256xf32>
    %207 = vector.extract_strided_slice %183 {offsets = [4, 0], sizes = [1, 256], strides = [1, 1]} : vector<16x256xf32> to vector<1x256xf32>
    %208 = vector.broadcast %207 : vector<1x256xf32> to vector<8x256xf32>
    %209 = arith.mulf %206, %208 : vector<8x256xf32>
    %210 = arith.addf %205, %209 : vector<8x256xf32>
    %211 = vector.extract_strided_slice %184 {offsets = [40, 0], sizes = [8, 256], strides = [1, 1]} : vector<128x256xf32> to vector<8x256xf32>
    %212 = vector.extract_strided_slice %183 {offsets = [5, 0], sizes = [1, 256], strides = [1, 1]} : vector<16x256xf32> to vector<1x256xf32>
    %213 = vector.broadcast %212 : vector<1x256xf32> to vector<8x256xf32>
    %214 = arith.mulf %211, %213 : vector<8x256xf32>
    %215 = arith.addf %210, %214 : vector<8x256xf32>
    %216 = vector.extract_strided_slice %184 {offsets = [48, 0], sizes = [8, 256], strides = [1, 1]} : vector<128x256xf32> to vector<8x256xf32>
    %217 = vector.extract_strided_slice %183 {offsets = [6, 0], sizes = [1, 256], strides = [1, 1]} : vector<16x256xf32> to vector<1x256xf32>
    %218 = vector.broadcast %217 : vector<1x256xf32> to vector<8x256xf32>
    %219 = arith.mulf %216, %218 : vector<8x256xf32>
    %220 = arith.addf %215, %219 : vector<8x256xf32>
    %221 = vector.extract_strided_slice %184 {offsets = [56, 0], sizes = [8, 256], strides = [1, 1]} : vector<128x256xf32> to vector<8x256xf32>
    %222 = vector.extract_strided_slice %183 {offsets = [7, 0], sizes = [1, 256], strides = [1, 1]} : vector<16x256xf32> to vector<1x256xf32>
    %223 = vector.broadcast %222 : vector<1x256xf32> to vector<8x256xf32>
    %224 = arith.mulf %221, %223 : vector<8x256xf32>
    %225 = arith.addf %220, %224 : vector<8x256xf32>
    %226 = vector.extract_strided_slice %184 {offsets = [64, 0], sizes = [8, 256], strides = [1, 1]} : vector<128x256xf32> to vector<8x256xf32>
    %227 = vector.extract_strided_slice %183 {offsets = [8, 0], sizes = [1, 256], strides = [1, 1]} : vector<16x256xf32> to vector<1x256xf32>
    %228 = vector.broadcast %227 : vector<1x256xf32> to vector<8x256xf32>
    %229 = arith.mulf %226, %228 : vector<8x256xf32>
    %230 = arith.addf %225, %229 : vector<8x256xf32>
    %231 = vector.extract_strided_slice %184 {offsets = [72, 0], sizes = [8, 256], strides = [1, 1]} : vector<128x256xf32> to vector<8x256xf32>
    %232 = vector.extract_strided_slice %183 {offsets = [9, 0], sizes = [1, 256], strides = [1, 1]} : vector<16x256xf32> to vector<1x256xf32>
    %233 = vector.broadcast %232 : vector<1x256xf32> to vector<8x256xf32>
    %234 = arith.mulf %231, %233 : vector<8x256xf32>
    %235 = arith.addf %230, %234 : vector<8x256xf32>
    %236 = vector.extract_strided_slice %184 {offsets = [80, 0], sizes = [8, 256], strides = [1, 1]} : vector<128x256xf32> to vector<8x256xf32>
    %237 = vector.extract_strided_slice %183 {offsets = [10, 0], sizes = [1, 256], strides = [1, 1]} : vector<16x256xf32> to vector<1x256xf32>
    %238 = vector.broadcast %237 : vector<1x256xf32> to vector<8x256xf32>
    %239 = arith.mulf %236, %238 : vector<8x256xf32>
    %240 = arith.addf %235, %239 : vector<8x256xf32>
    %241 = vector.extract_strided_slice %184 {offsets = [88, 0], sizes = [8, 256], strides = [1, 1]} : vector<128x256xf32> to vector<8x256xf32>
    %242 = vector.extract_strided_slice %183 {offsets = [11, 0], sizes = [1, 256], strides = [1, 1]} : vector<16x256xf32> to vector<1x256xf32>
    %243 = vector.broadcast %242 : vector<1x256xf32> to vector<8x256xf32>
    %244 = arith.mulf %241, %243 : vector<8x256xf32>
    %245 = arith.addf %240, %244 : vector<8x256xf32>
    %246 = vector.extract_strided_slice %184 {offsets = [96, 0], sizes = [8, 256], strides = [1, 1]} : vector<128x256xf32> to vector<8x256xf32>
    %247 = vector.extract_strided_slice %183 {offsets = [12, 0], sizes = [1, 256], strides = [1, 1]} : vector<16x256xf32> to vector<1x256xf32>
    %248 = vector.broadcast %247 : vector<1x256xf32> to vector<8x256xf32>
    %249 = arith.mulf %246, %248 : vector<8x256xf32>
    %250 = arith.addf %245, %249 : vector<8x256xf32>
    %251 = vector.extract_strided_slice %184 {offsets = [104, 0], sizes = [8, 256], strides = [1, 1]} : vector<128x256xf32> to vector<8x256xf32>
    %252 = vector.extract_strided_slice %183 {offsets = [13, 0], sizes = [1, 256], strides = [1, 1]} : vector<16x256xf32> to vector<1x256xf32>
    %253 = vector.broadcast %252 : vector<1x256xf32> to vector<8x256xf32>
    %254 = arith.mulf %251, %253 : vector<8x256xf32>
    %255 = arith.addf %250, %254 : vector<8x256xf32>
    %256 = vector.extract_strided_slice %184 {offsets = [112, 0], sizes = [8, 256], strides = [1, 1]} : vector<128x256xf32> to vector<8x256xf32>
    %257 = vector.extract_strided_slice %183 {offsets = [14, 0], sizes = [1, 256], strides = [1, 1]} : vector<16x256xf32> to vector<1x256xf32>
    %258 = vector.broadcast %257 : vector<1x256xf32> to vector<8x256xf32>
    %259 = arith.mulf %256, %258 : vector<8x256xf32>
    %260 = arith.addf %255, %259 : vector<8x256xf32>
    %261 = vector.extract_strided_slice %184 {offsets = [120, 0], sizes = [8, 256], strides = [1, 1]} : vector<128x256xf32> to vector<8x256xf32>
    %262 = vector.extract_strided_slice %183 {offsets = [15, 0], sizes = [1, 256], strides = [1, 1]} : vector<16x256xf32> to vector<1x256xf32>
    %263 = vector.broadcast %262 : vector<1x256xf32> to vector<8x256xf32>
    %264 = arith.mulf %261, %263 : vector<8x256xf32>
    %265 = arith.addf %260, %264 : vector<8x256xf32>
    %c0_51 = arith.constant 0 : index
    %c0_52 = arith.constant 0 : index
    %266 = vector.load %arg3[%c0_51, %c0_52] : memref<8x256xf32, #tpu.memory_space<vmem>>, vector<8x256xf32>
    tpu.vector_store %arg3[%c0_51, %c0_52], %265 {strides = array<i32>} : memref<8x256xf32, #tpu.memory_space<vmem>>, vector<8x256xf32>,
    return
  }
  func.func @transform_0(%arg0: i32) -> (i32, i32) {
    %c0_i32 = arith.constant 0 : i32
    %c0_i32_0 = arith.constant 0 : i32
    return %c0_i32, %arg0 : i32, i32
  }
  func.func @transform_1(%arg0: i32) -> (i32, i32) {
    %c0_i32 = arith.constant 0 : i32
    %c0_i32_0 = arith.constant 0 : i32
    %c0_i32_1 = arith.constant 0 : i32
    return %c0_i32, %c0_i32_0 : i32, i32
  }
  func.func @transform_2(%arg0: i32) -> (i32, i32) {
    %c0_i32 = arith.constant 0 : i32
    %c0_i32_0 = arith.constant 0 : i32
    return %c0_i32, %arg0 : i32, i32
  }
}

</mosaic_0001>

<bundles_post_ra>
// kernel: tpu_custom_call.1
= control target key start
LH: loop header
LB: loop body
LE: loop exit
PB: predicated region body
PF: predicated region fallthrough
CT: control target
= control target key end

     0   :  { %7 = vsyncpa [#allocation3], 0  ;;  %s1576_s0 = inlined_call_operand.hbm [shape: f32[4,256], index: 0, kind: input, shape index: {}]   ;;  %s1577_s1 = inlined_call_operand.hbm [shape: f32[128,128], index: 1, kind: input, shape index: {}]   ;;  %s1578_s2 = inlined_call_operand.hbm [shape: f32[8,256], index: 2, kind: output, shape index: {}]  }
   0x1   :  { %8 = vsyncpa [#allocation6], 0 }
   0x2   :  { %9 = vsyncpa [#allocation4], 0  ;;  %s1043_s9 = smov [#allocation2]   ;;  %s1044_s11 = smov [#allocation5]  }
   0x3   :  { %s16_s10 = sshll.u32 %s1043_s9, 4  ;;  %s25_s12 = sshll.u32 %s1044_s11, 4  ;;  %s17_s10 = int_to_ptr.vmem [resolvable:$true] %s16_s10  ;;  %s26_s12 = int_to_ptr.vmem [resolvable:$true] %s25_s12 }
   0x4   :  { %s985_s13 = scalar_lea.vmem %s17_s10, 128  ;;  %p990_p1 = scmp.lt.s32.totalorder %s17_s10, %s17_s10 }
   0x5   :  { %p986_p0 = scmp.ne.s32.totalorder %s17_s10, %s985_s13  ;;  %p991_p2 = scmp.lt.s32.totalorder %s985_s13, %s985_s13 }
   0x7   :  { %p992_p3 = por %p991_p2, %p990_p1 }
   0x9   :  { %p993_p4 = pnand %p992_p3, %p986_p0 }
   0xb   :  { %996 = shalt.err (!%p993_p4)
}
   0xc   :  { %19 = dma.hbm_to_vmem [thread:$0]  %s1576_s0, 128, %s17_s10, [#allocation3]  }
   0xd   :  { %s1005_s16 = scalar_lea.vmem %s26_s12, 2048  ;;  %p1010_p6 = scmp.lt.s32.totalorder %s26_s12, %s26_s12 }
   0xe   :  { %p1006_p5 = scmp.ne.s32.totalorder %s26_s12, %s1005_s16  ;;  %p1011_p7 = scmp.lt.s32.totalorder %s1005_s16, %s1005_s16 }
  0x10   :  { %p1012_p8 = por %p1011_p7, %p1010_p6 }
  0x12   :  { %p1013_p9 = pnand %p1012_p8, %p1006_p5 }
  0x14   :  { %1016 = shalt.err (!%p1013_p9)
}
  0x15   :  { %s1045_s17 = smov 128   ;;  %s1046_s18 = smov 8  }
  0x16   :  { %31 = dma.hbm_to_vmem [thread:$0]  %s1577_s1, 2048, %s26_s12, [#allocation6], %s1045_s17, %s1045_s17, %s1046_s18  }
  0x17   :  { %1037 = dma.done.wait [#allocation3], 128  }
  0x18   :  { %1038 = vsyncadd [#allocation3], 4294967168 }
  0x19   :  { %1039 = dma.done.wait [#allocation6], 2048  }
  0x1a   :  { %1040 = vsyncadd [#allocation6], 4294965248  ;;  %v1047_v0 = vmov 0.0   ;;  %v38_v1 = vld [vmem:[#allocation2] sm:$0xff]  ;;  %v82_v7 = vlaneseq  ;;  %s1048_s0 = smov [#allocation7]  }
  0x1b   :  { %622 = vmatprep.mubr.f32.mxu0 %v1047_v0  ;;  %670 = vmatprep.mubr.f32.mxu1 %v1047_v0  ;;  %v39_v2 = vmul.f32 0.5, %v38_v1  ;;  %vm46_vm0 = vcmp.lt.f32.partialorder %v38_v1, 0.0  ;;  %s919_s1 = sshll.u32 %s1048_s0, 4  ;;  %s920_s1 = int_to_ptr.vmem [resolvable:$true] %s919_s1 }
  0x1c   :  { %v1072_v12 = vshrl.u32 %v82_v7, 7  ;;  %s1017_s21 = scalar_lea.vmem %s920_s1, 256  ;;  %p1022_p11 = scmp.lt.s32.totalorder %s920_s1, %s920_s1 }
  0x1d   :  { %v41_v3 = vrot.slane %v39_v2, 6  ;;  %p1018_p10 = scmp.ne.s32.totalorder %s920_s1, %s1017_s21  ;;  %p1023_p12 = scmp.lt.s32.totalorder %s1017_s21, %s1017_s21 }
  0x1e   :  { %v1075_v17 = vadd.s32 120, %v1072_v12  ;;  %v1078_v18 = vsub.s32 3, %v1072_v12  ;;  %v1081_v19 = vsub.s32 7, %v1072_v12  ;;  %v1084_v22 = vsub.s32 2, %v1072_v12 }
  0x1f   :  { %v42_v4 = vrot.slane %v41_v3, 4  ;;  %v1087_v23 = vadd.s32 112, %v1072_v12  ;;  %v1091_v25 = vadd.s32 8, %v1072_v12  ;;  %v1094_v26 = vsub.s32 6, %v1072_v12  ;;  %p1024_p13 = por %p1023_p12, %p1022_p11 }
  0x20   :  { %v1099_v31 = vadd.s32 104, %v1072_v12  ;;  %v1102_v32 = vadd.s32 96, %v1072_v12  ;;  %v1107_v37 = vadd.s32 88, %v1072_v12  ;;  %v1111_v39 = vadd.s32 80, %v1072_v12 }
  0x21   :  { %v44_v5 = vsub.f32 %v38_v1, %v42_v4  ;;  %v45_v6 = vadd.f32 %v42_v4, %v38_v1  ;;  %vm199_vm2 = vcmp.eq.s32.totalorder %v1091_v25, 15  ;;  %v1117_v44 = vadd.s32 72, %v1072_v12  ;;  %p1025_p0 = pnand %p1024_p13, %p1018_p10 }
  0x22   :  { %v1124_v46 = vadd.s32 64, %v1072_v12  ;;  %v1127_v47 = vadd.s32 56, %v1072_v12  ;;  %v1137_v52 = vadd.s32 48, %v1072_v12  ;;  %v1140_v53 = vadd.s32 40, %v1072_v12 }
  0x23   :  { %v48_v8 = vrot.slane %v45_v6, 6  ;;  %v51_v9 = vrot.slane %v44_v5, 6  ;;  %v1143_v54 = vadd.s32 32, %v1072_v12  ;;  %v1146_v55 = vadd.s32 24, %v1072_v12 }
  0x24   :  { %v1149_v56 = vadd.s32 16, %v1072_v12 }
  0x25   :  { %v53_v10 = vsel %vm46_vm0, %v48_v8, %v51_v9  ;;  %v54_v11 = vsel %vm46_vm0, %v51_v9, %v48_v8 }
  0x26   :  { %v55_v13 = vfloor.f32 %v53_v10  ;;  %v57_v14 = vfloor.f32 %v54_v11 }
  0x28   :  { %v56_v15 = vsub.f32 %v53_v10, %v55_v13  ;;  %v58_v16 = vsub.f32 %v54_v11, %v57_v14 }
  0x2a   :  { %v62_v20 = vmul.f32 16.0, %v58_v16  ;;  %v932_v21 = vadd.f32 -0.0625, %v56_v15  ;;  %vm59_vm1 = vcmp.gt.f32.partialorder %v56_v15, %v58_v16 }
  0x2b   :  { %v929_v24 = vsel %vm59_vm1, 1.0, %v1047_v0 }
  0x2c   :  { %v930_v27 = vadd.f32 -0.5, %v62_v20  ;;  %v72_v28 = vmul.f32 16.0, %v932_v21  ;;  %v222_v29 = vrot.slane %v929_v24, %v1081_v19  ;;  %v489_v30 = vrot.slane %v929_v24, %v1084_v22 }
  0x2d   :  { %v493_v33 = vrot.slane %v929_v24, %v1094_v26  ;;  %v218_v34 = vrot.slane %v929_v24, %v1078_v18 }
  0x2e   :  { %v64_v35 = vfloor.f32 %v930_v27  ;;  %v933_v36 = vadd.f32 -0.5, %v72_v28  ;;  %v499_v38 = vrot.slane %v489_v30, %v1084_v22  ;;  %v232_v40 = vrot.slane %v222_v29, %v1078_v18 }
  0x2f   :  { %v503_v41 = vrot.slane %v493_v33, %v1084_v22  ;;  %v228_v49 = vrot.slane %v218_v34, %v1078_v18 }
  0x30   :  { %v967_v42 = vtrunc.f32 %v64_v35  ;;  %v74_v43 = vfloor.f32 %v933_v36  ;;  %v1121_v45 = vsel %vm199_vm2, %v499_v38, 0.0  ;;  %v1153_v57 = vsel %vm199_vm2, %v232_v40, 0.0 }
  0x31   :  { %v1131_v48 = vsel %vm199_vm2, %v503_v41, 0.0  ;;  %v1169_v63 = vsel %vm199_vm2, %v228_v49, 0.0 }
  0x32   :  { %v1134_v50 = vcvt.f32.s32 %v967_v42  ;;  %v969_v51 = vtrunc.f32 %v74_v43 }
  0x34   :  { %vm66_vm3 = vcmp.ge.s32.totalorder %v1134_v50, 0  ;;  %vm67_vm4 = vcmp.lt.s32.totalorder %v1134_v50, 16  ;;  %v1157_v58 = vcvt.f32.s32 %v969_v51  ;;  %v106_v59 = vrot.slane %v1134_v50, %v1081_v19 }
  0x35   :  { %vm68_vm5 = vmand %vm66_vm3, %vm67_vm4  ;;  %v102_v60 = vrot.slane %v1134_v50, %v1078_v18  ;;  %v447_v61 = vrot.slane %v1134_v50, %v1084_v22  ;;  %v451_v62 = vrot.slane %v1134_v50, %v1094_v26 }
  0x36   :  { %v1172_v1 = vsel %vm68_vm5, 1.0, %v1047_v0  ;;  %vm76_vm6 = vcmp.ge.s32.totalorder %v1157_v58, 0  ;;  %vm77_vm7 = vcmp.lt.s32.totalorder %v1157_v58, 16  ;;  %v1177_v2 = vrot.slane %v106_v59, %v1078_v18 }
  0x37   :  { %vm78_vm8 = vmand %vm76_vm6, %vm77_vm7  ;;  %v155_v3 = vrot.slane %v1172_v1, %v1081_v19  ;;  %v304_v4 = vrot.slane %v1157_v58, %v1081_v19  ;;  %v1184_v5 = vrot.slane %v102_v60, %v1078_v18  ;;  %v151_v6 = vrot.slane %v1172_v1, %v1078_v18 }
  0x38   :  { %v934_v7 = vsel %vm78_vm8, 1.0, %v1047_v0  ;;  %vm146_vm9 = vcmp.eq.s32.totalorder %v1075_v17, %v1177_v2  ;;  %v300_v8 = vrot.slane %v1157_v58, %v1078_v18  ;;  %vm144_vm10 = vcmp.eq.s32.totalorder %v1087_v23, %v1177_v2 }
  0x39   :  { %v1195_v9 = vsub.f32 0.0, %v934_v7  ;;  %v1198_v10 = vrot.slane %v155_v3, %v1078_v18  ;;  %v1201_v11 = vrot.slane %v304_v4, %v1078_v18  ;;  %vm145_vm11 = vcmp.eq.s32.totalorder %v1075_v17, %v1184_v5 }
  0x3a   :  { %v1206_v13 = vrot.slane %v151_v6, %v1078_v18  ;;  %v1209_v14 = vrot.slane %v300_v8, %v1078_v18  ;;  %vm143_vm12 = vcmp.eq.s32.totalorder %v1087_v23, %v1184_v5  ;;  %vm142_vm13 = vcmp.eq.s32.totalorder %v1099_v31, %v1177_v2 }
  0x3b   :  { %v197_v15 = vsel %vm146_vm9, %v1198_v10, 0.0  ;;  %vm344_vm14 = vcmp.eq.s32.totalorder %v1075_v17, %v1201_v11  ;;  %v353_v16 = vrot.slane %v1195_v9, %v1081_v19  ;;  %v349_v20 = vrot.slane %v1195_v9, %v1078_v18 }
  0x3c   :  { %v196_v21 = vsel %vm145_vm11, %v1206_v13, 0.0  ;;  %vm343_vm15 = vcmp.eq.s32.totalorder %v1075_v17, %v1209_v14  ;;  %v195_v24 = vsel %vm144_vm10, %v1198_v10, 0.0  ;;  %vm342_vm0 = vcmp.eq.s32.totalorder %v1087_v23, %v1201_v11 }
  0x3d   :  { %v1229_v27 = vrot.slane %v353_v16, %v1078_v18  ;;  %v1232_v28 = vrot.slane %v349_v20, %v1078_v18  ;;  %v194_v29 = vsel %vm143_vm12, %v1206_v13, 0.0  ;;  %vm341_vm1 = vcmp.eq.s32.totalorder %v1087_v23, %v1209_v14 }
  0x3e   :  { %v193_v30 = vsel %vm142_vm13, %v1198_v10, 0.0  ;;  %vm340_vm2 = vcmp.eq.s32.totalorder %v1099_v31, %v1201_v11  ;;  %vm141_vm3 = vcmp.eq.s32.totalorder %v1099_v31, %v1184_v5  ;;  %vm339_vm4 = vcmp.eq.s32.totalorder %v1099_v31, %v1209_v14 }
  0x3f   :  { %v395_v17 = vsel %vm344_vm14, %v1229_v27, 0.0  ;;  %v394_v33 = vsel %vm343_vm15, %v1232_v28, 0.0  ;;  %v393_v34 = vsel %vm342_vm0, %v1229_v27, 0.0  ;;  %v392_v35 = vsel %vm341_vm1, %v1232_v28, 0.0 }
  0x40   :  { %v427_v23 = vadd.f32 %v395_v17, %v197_v15  ;;  %v426_v36 = vadd.f32 %v394_v33, %v196_v21  ;;  %v425_v38 = vadd.f32 %v393_v34, %v195_v24  ;;  %v424_v40 = vadd.f32 %v392_v35, %v194_v29 }
  0x41   :  { %v391_v41 = vsel %vm340_vm2, %v1229_v27, 0.0  ;;  %v192_v42 = vsel %vm141_vm3, %v1206_v13, 0.0  ;;  %v390_v43 = vsel %vm339_vm4, %v1232_v28, 0.0  ;;  %vm140_vm5 = vcmp.eq.s32.totalorder %v1102_v32, %v1177_v2 }
  0x42   :  { %558 = vmatprep.subr.mxu0 %v427_v23  ;;  %v423_v31 = vadd.f32 %v391_v41, %v193_v30  ;;  %v422_v49 = vadd.f32 %v390_v43, %v192_v42  ;;  %v191_v51 = vsel %vm140_vm5, %v1198_v10, 0.0  ;;  %vm338_vm6 = vcmp.eq.s32.totalorder %v1102_v32, %v1201_v11  ;;  %935 = vmatprep.subr.mxu1 %v427_v23 }
  0x43   :  { %559 = vmatpush1.msra.mxu0 %v426_v36  ;;  %v389_v59 = vsel %vm338_vm6, %v1229_v27, 0.0  ;;  %vm139_vm7 = vcmp.eq.s32.totalorder %v1102_v32, %v1184_v5  ;;  %vm337_vm8 = vcmp.eq.s32.totalorder %v1102_v32, %v1209_v14  ;;  %vm138_vm9 = vcmp.eq.s32.totalorder %v1107_v37, %v1177_v2  ;;  %951 = vmatpush1.msra.mxu1 %v426_v36 }
  0x44   :  { %560 = vmatprep.subr.mxu0 %v425_v38  ;;  %v421_v60 = vadd.f32 %v389_v59, %v191_v51  ;;  %v190_v3 = vsel %vm139_vm7, %v1206_v13, 0.0  ;;  %v388_v4 = vsel %vm337_vm8, %v1232_v28, 0.0  ;;  %v189_v6 = vsel %vm138_vm9, %v1198_v10, 0.0  ;;  %936 = vmatprep.subr.mxu1 %v425_v38 }
  0x45   :  { %561 = vmatpush1.msra.mxu0 %v424_v40  ;;  %v420_v7 = vadd.f32 %v388_v4, %v190_v3  ;;  %vm336_vm10 = vcmp.eq.s32.totalorder %v1107_v37, %v1201_v11  ;;  %vm137_vm11 = vcmp.eq.s32.totalorder %v1107_v37, %v1184_v5  ;;  %vm335_vm12 = vcmp.eq.s32.totalorder %v1107_v37, %v1209_v14 }
  0x46   :  { %562 = vmatprep.subr.mxu0 %v423_v31  ;;  %v387_v32 = vsel %vm336_vm10, %v1229_v27, 0.0  ;;  %v188_v8 = vsel %vm137_vm11, %v1206_v13, 0.0  ;;  %v386_v15 = vsel %vm335_vm12, %v1232_v28, 0.0  ;;  %vm136_vm13 = vcmp.eq.s32.totalorder %v1111_v39, %v1177_v2  ;;  %952 = vmatpush1.msra.mxu1 %v424_v40 }
  0x47   :  { %563 = vmatpush1.msra.mxu0 %v422_v49  ;;  %v419_v16 = vadd.f32 %v387_v32, %v189_v6  ;;  %v418_v20 = vadd.f32 %v386_v15, %v188_v8  ;;  %v187_v21 = vsel %vm136_vm13, %v1198_v10, 0.0  ;;  %vm334_vm14 = vcmp.eq.s32.totalorder %v1111_v39, %v1201_v11  ;;  %937 = vmatprep.subr.mxu1 %v423_v31 }
  0x48   :  { %564 = vmatprep.subr.mxu0 %v421_v60  ;;  %v385_v37 = vsel %vm334_vm14, %v1229_v27, 0.0  ;;  %vm135_vm15 = vcmp.eq.s32.totalorder %v1111_v39, %v1184_v5  ;;  %vm333_vm0 = vcmp.eq.s32.totalorder %v1111_v39, %v1209_v14  ;;  %vm134_vm1 = vcmp.eq.s32.totalorder %v1117_v44, %v1177_v2  ;;  %953 = vmatpush1.msra.mxu1 %v422_v49 }
  0x49   :  { %565 = vmatpush1.msra.mxu0 %v420_v7  ;;  %v417_v24 = vadd.f32 %v385_v37, %v187_v21  ;;  %v186_v29 = vsel %vm135_vm15, %v1206_v13, 0.0  ;;  %v384_v30 = vsel %vm333_vm0, %v1232_v28, 0.0  ;;  %v185_v17 = vsel %vm134_vm1, %v1198_v10, 0.0  ;;  %938 = vmatprep.subr.mxu1 %v421_v60 }
  0x4a   :  { %566 = vmatprep.subr.mxu0 %v419_v16  ;;  %v416_v33 = vadd.f32 %v384_v30, %v186_v29  ;;  %vm332_vm2 = vcmp.eq.s32.totalorder %v1117_v44, %v1201_v11  ;;  %vm133_vm3 = vcmp.eq.s32.totalorder %v1117_v44, %v1184_v5  ;;  %vm331_vm4 = vcmp.eq.s32.totalorder %v1117_v44, %v1209_v14 }
  0x4b   :  { %567 = vmatpush1.msra.mxu0 %v418_v20  ;;  %v383_v39 = vsel %vm332_vm2, %v1229_v27, 0.0  ;;  %v184_v34 = vsel %vm133_vm3, %v1206_v13, 0.0  ;;  %v382_v35 = vsel %vm331_vm4, %v1232_v28, 0.0  ;;  %vm132_vm5 = vcmp.eq.s32.totalorder %v1124_v46, %v1177_v2  ;;  %954 = vmatpush1.msra.mxu1 %v420_v7 }
  0x4c   :  { %568 = vmatprep.subr.mxu0 %v417_v24  ;;  %v415_v23 = vadd.f32 %v383_v39, %v185_v17  ;;  %v414_v36 = vadd.f32 %v382_v35, %v184_v34  ;;  %v183_v38 = vsel %vm132_vm5, %v1198_v10, 0.0  ;;  %vm330_vm6 = vcmp.eq.s32.totalorder %v1124_v46, %v1201_v11  ;;  %939 = vmatprep.subr.mxu1 %v419_v16 }
  0x4d   :  { %569 = vmatpush1.msra.mxu0 %v416_v33  ;;  %v381_v44 = vsel %vm330_vm6, %v1229_v27, 0.0  ;;  %vm131_vm7 = vcmp.eq.s32.totalorder %v1124_v46, %v1184_v5  ;;  %vm329_vm8 = vcmp.eq.s32.totalorder %v1124_v46, %v1209_v14  ;;  %vm130_vm9 = vcmp.eq.s32.totalorder %v1127_v47, %v1177_v2  ;;  %955 = vmatpush1.msra.mxu1 %v418_v20 }
  0x4e   :  { %570 = vmatprep.subr.mxu0 %v415_v23  ;;  %v413_v40 = vadd.f32 %v381_v44, %v183_v38  ;;  %v182_v41 = vsel %vm131_vm7, %v1206_v13, 0.0  ;;  %v380_v42 = vsel %vm329_vm8, %v1232_v28, 0.0  ;;  %v181_v43 = vsel %vm130_vm9, %v1198_v10, 0.0  ;;  %940 = vmatprep.subr.mxu1 %v417_v24 }
  0x4f   :  { %571 = vmatpush1.msra.mxu0 %v414_v36  ;;  %v412_v31 = vadd.f32 %v380_v42, %v182_v41  ;;  %vm328_vm10 = vcmp.eq.s32.totalorder %v1127_v47, %v1201_v11  ;;  %vm129_vm11 = vcmp.eq.s32.totalorder %v1127_v47, %v1184_v5  ;;  %vm327_vm12 = vcmp.eq.s32.totalorder %v1127_v47, %v1209_v14 }
  0x50   :  { %572 = vmatprep.subr.mxu0 %v413_v40  ;;  %v379_v46 = vsel %vm328_vm10, %v1229_v27, 0.0  ;;  %v180_v49 = vsel %vm129_vm11, %v1206_v13, 0.0  ;;  %v378_v51 = vsel %vm327_vm12, %v1232_v28, 0.0  ;;  %vm128_vm13 = vcmp.eq.s32.totalorder %v1137_v52, %v1177_v2  ;;  %956 = vmatpush1.msra.mxu1 %v416_v33 }
  0x51   :  { %573 = vmatpush1.msra.mxu0 %v412_v31  ;;  %v411_v59 = vadd.f32 %v379_v46, %v181_v43  ;;  %v410_v60 = vadd.f32 %v378_v51, %v180_v49  ;;  %v179_v3 = vsel %vm128_vm13, %v1198_v10, 0.0  ;;  %vm326_vm14 = vcmp.eq.s32.totalorder %v1137_v52, %v1201_v11  ;;  %941 = vmatprep.subr.mxu1 %v415_v23 }
  0x52   :  { %v377_v47 = vsel %vm326_vm14, %v1229_v27, 0.0  ;;  %vm127_vm15 = vcmp.eq.s32.totalorder %v1137_v52, %v1184_v5  ;;  %vm325_vm0 = vcmp.eq.s32.totalorder %v1137_v52, %v1209_v14  ;;  %vm126_vm1 = vcmp.eq.s32.totalorder %v1140_v53, %v1177_v2  ;;  %957 = vmatpush1.msra.mxu1 %v414_v36 }
  0x53   :  { %574 = vmatprep.subr.mxu0 %v411_v59  ;;  %v409_v4 = vadd.f32 %v377_v47, %v179_v3  ;;  %v178_v6 = vsel %vm127_vm15, %v1206_v13, 0.0  ;;  %v376_v7 = vsel %vm325_vm0, %v1232_v28, 0.0  ;;  %v177_v32 = vsel %vm126_vm1, %v1198_v10, 0.0  ;;  %942 = vmatprep.subr.mxu1 %v413_v40 }
  0x54   :  { %575 = vmatpush1.msra.mxu0 %v410_v60  ;;  %v408_v8 = vadd.f32 %v376_v7, %v178_v6  ;;  %vm324_vm2 = vcmp.eq.s32.totalorder %v1140_v53, %v1201_v11  ;;  %vm125_vm3 = vcmp.eq.s32.totalorder %v1140_v53, %v1184_v5  ;;  %vm323_vm4 = vcmp.eq.s32.totalorder %v1140_v53, %v1209_v14 }
  0x55   :  { %576 = vmatprep.subr.mxu0 %v409_v4  ;;  %v375_v52 = vsel %vm324_vm2, %v1229_v27, 0.0  ;;  %v176_v15 = vsel %vm125_vm3, %v1206_v13, 0.0  ;;  %v374_v16 = vsel %vm323_vm4, %v1232_v28, 0.0  ;;  %vm124_vm5 = vcmp.eq.s32.totalorder %v1143_v54, %v1177_v2  ;;  %958 = vmatpush1.msra.mxu1 %v412_v31 }
  0x56   :  { %577 = vmatpush1.msra.mxu0 %v408_v8  ;;  %v407_v20 = vadd.f32 %v375_v52, %v177_v32  ;;  %v406_v21 = vadd.f32 %v374_v16, %v176_v15  ;;  %v175_v37 = vsel %vm124_vm5, %v1198_v10, 0.0  ;;  %vm322_vm6 = vcmp.eq.s32.totalorder %v1143_v54, %v1201_v11  ;;  %943 = vmatprep.subr.mxu1 %v411_v59 }
  0x57   :  { %v373_v53 = vsel %vm322_vm6, %v1229_v27, 0.0  ;;  %vm123_vm7 = vcmp.eq.s32.totalorder %v1143_v54, %v1184_v5  ;;  %vm321_vm8 = vcmp.eq.s32.totalorder %v1143_v54, %v1209_v14  ;;  %vm122_vm9 = vcmp.eq.s32.totalorder %v1146_v55, %v1177_v2  ;;  %959 = vmatpush1.msra.mxu1 %v410_v60 }
  0x58   :  { %578 = vmatprep.subr.mxu0 %v407_v20  ;;  %v405_v24 = vadd.f32 %v373_v53, %v175_v37  ;;  %v174_v29 = vsel %vm123_vm7, %v1206_v13, 0.0  ;;  %v372_v30 = vsel %vm321_vm8, %v1232_v28, 0.0  ;;  %v173_v17 = vsel %vm122_vm9, %v1198_v10, 0.0  ;;  %944 = vmatprep.subr.mxu1 %v409_v4 }
  0x59   :  { %579 = vmatpush1.msra.mxu0 %v406_v21  ;;  %v404_v33 = vadd.f32 %v372_v30, %v174_v29  ;;  %vm320_vm10 = vcmp.eq.s32.totalorder %v1146_v55, %v1201_v11  ;;  %vm121_vm11 = vcmp.eq.s32.totalorder %v1146_v55, %v1184_v5  ;;  %vm319_vm12 = vcmp.eq.s32.totalorder %v1146_v55, %v1209_v14 }
  0x5a   :  { %580 = vmatprep.subr.mxu0 %v405_v24  ;;  %v371_v54 = vsel %vm320_vm10, %v1229_v27, 0.0  ;;  %v172_v39 = vsel %vm121_vm11, %v1206_v13, 0.0  ;;  %v370_v34 = vsel %vm319_vm12, %v1232_v28, 0.0  ;;  %vm120_vm13 = vcmp.eq.s32.totalorder %v1149_v56, %v1177_v2  ;;  %960 = vmatpush1.msra.mxu1 %v408_v8 }
  0x5b   :  { %581 = vmatpush1.msra.mxu0 %v404_v33  ;;  %v403_v35 = vadd.f32 %v371_v54, %v173_v17  ;;  %v402_v23 = vadd.f32 %v370_v34, %v172_v39  ;;  %v171_v36 = vsel %vm120_vm13, %v1198_v10, 0.0  ;;  %vm318_vm14 = vcmp.eq.s32.totalorder %v1149_v56, %v1201_v11  ;;  %945 = vmatprep.subr.mxu1 %v407_v20  ;;  %v428_v34 = vld [vmem:[#allocation5] sm:$0xff] }
  0x5c   :  { %v369_v55 = vsel %vm318_vm14, %v1229_v27, 0.0  ;;  %vm119_vm15 = vcmp.eq.s32.totalorder %v1149_v56, %v1184_v5  ;;  %vm317_vm0 = vcmp.eq.s32.totalorder %v1149_v56, %v1209_v14  ;;  %vm118_vm1 = vcmp.eq.s32.totalorder %v1091_v25, %v1177_v2  ;;  %961 = vmatpush1.msra.mxu1 %v406_v21 }
  0x5d   :  { %582 = vmatprep.subr.mxu0 %v403_v35  ;;  %v401_v38 = vadd.f32 %v369_v55, %v171_v36  ;;  %v170_v44 = vsel %vm119_vm15, %v1206_v13, 0.0  ;;  %v368_v40 = vsel %vm317_vm0, %v1232_v28, 0.0  ;;  %v169_v41 = vsel %vm118_vm1, %v1198_v10, 0.0  ;;  %946 = vmatprep.subr.mxu1 %v405_v24  ;;  %v433_v36 = vld [vmem:[#allocation5 + $0x28] sm:$0xff] }
  0x5e   :  { %583 = vmatpush1.msra.mxu0 %v402_v23  ;;  %v400_v42 = vadd.f32 %v368_v40, %v170_v44  ;;  %v268_v43 = vadd.f32 %v1153_v57, %v169_v41  ;;  %vm316_vm2 = vcmp.eq.s32.totalorder %v1091_v25, %v1201_v11  ;;  %v455_v56 = vrot.slane %v447_v61, %v1084_v22  ;;  %v441_v55 = vld [vmem:[#allocation5 + $0x68] sm:$0xff]  ;;  %v442_v44 = vld [vmem:[#allocation5 + $0x70] sm:$0xff]  ;;  %v435_v40 = vld [vmem:[#allocation5 + $0x38] sm:$0xff] }
  0x5f   :  { %584 = vmatprep.subr.mxu0 %v401_v38  ;;  %v367_v31 = vsel %vm316_vm2, %v1229_v27, 0.0  ;;  %v459_v46 = vrot.slane %v451_v62, %v1084_v22  ;;  %v467_v49 = vrot.slane %v1172_v1, %v1084_v22  ;;  %v471_v57 = vrot.slane %v1172_v1, %v1094_v26  ;;  %962 = vmatpush1.msra.mxu1 %v404_v33  ;;  %v443_v41 = vld [vmem:[#allocation5 + $0x78] sm:$0xff] }
  0x60   :  { %585 = vmatpush1.msra.mxu0 %v400_v42  ;;  %v399_v51 = vadd.f32 %v367_v31, %v268_v43  ;;  %vm460_vm3 = vcmp.eq.s32.totalorder %v1072_v12, %v455_v56  ;;  %vm462_vm4 = vcmp.eq.s32.totalorder %v1091_v25, %v455_v56  ;;  %v515_v61 = vrot.slane %v1157_v58, %v1084_v22 }
  0x61   :  { %vm461_vm5 = vcmp.eq.s32.totalorder %v1072_v12, %v459_v46  ;;  %vm463_vm6 = vcmp.eq.s32.totalorder %v1091_v25, %v459_v46  ;;  %v477_v50 = vrot.slane %v467_v49, %v1084_v22  ;;  %v481_v62 = vrot.slane %v471_v57, %v1084_v22  ;;  %947 = vmatprep.subr.mxu1 %v403_v35  ;;  %v432_v35 = vld [vmem:[#allocation5 + $0x20] sm:$0xff] }
  0x62   :  { %v519_v1 = vrot.slane %v1157_v58, %v1094_v26  ;;  %v523_v59 = vrot.slane %v515_v61, %v1084_v22  ;;  %v535_v60 = vrot.slane %v1195_v9, %v1084_v22  ;;  %v539_v3 = vrot.slane %v1195_v9, %v1094_v26  ;;  %586 = vmatprep.subr.mxu0 %v399_v51 }
  0x63   :  { %v482_v47 = vsel %vm460_vm3, %v477_v50, 0.0  ;;  %v483_v4 = vsel %vm461_vm5, %v481_v62, 0.0  ;;  %v484_v6 = vsel %vm462_vm4, %v477_v50, 0.0  ;;  %v485_v7 = vsel %vm463_vm6, %v481_v62, 0.0  ;;  %963 = vmatpush1.msra.mxu1 %v402_v23  ;;  %v440_v23 = vld [vmem:[#allocation5 + $0x60] sm:$0xff] }
  0x64   :  { %v510_v32 = vadd.f32 %v1121_v45, %v484_v6  ;;  %v511_v8 = vadd.f32 %v1131_v48, %v485_v7  ;;  %v527_v58 = vrot.slane %v519_v1, %v1084_v22  ;;  %vm528_vm7 = vcmp.eq.s32.totalorder %v1072_v12, %v523_v59  ;;  %948 = vmatprep.subr.mxu1 %v401_v38  ;;  %v434_v38 = vld [vmem:[#allocation5 + $0x30] sm:$0xff] }
  0x65   :  { %vm530_vm8 = vcmp.eq.s32.totalorder %v1091_v25, %v523_v59  ;;  %v545_v52 = vrot.slane %v535_v60, %v1084_v22  ;;  %v549_v9 = vrot.slane %v539_v3, %v1084_v22  ;;  %vm117_vm9 = vcmp.eq.s32.totalorder %v1091_v25, %v1184_v5  ;;  %964 = vmatpush1.msra.mxu1 %v400_v42 }
  0x66   :  { %vm529_vm10 = vcmp.eq.s32.totalorder %v1072_v12, %v527_v58  ;;  %vm531_vm11 = vcmp.eq.s32.totalorder %v1091_v25, %v527_v58  ;;  %v168_v45 = vsel %vm117_vm9, %v1206_v13, 0.0  ;;  %vm315_vm12 = vcmp.eq.s32.totalorder %v1091_v25, %v1209_v14  ;;  %949 = vmatprep.subr.mxu1 %v399_v51 }
  0x67   :  { %v550_v48 = vsel %vm528_vm7, %v545_v52, 0.0  ;;  %v551_v15 = vsel %vm529_vm10, %v549_v9, 0.0  ;;  %v552_v16 = vsel %vm530_vm8, %v545_v52, 0.0  ;;  %v553_v20 = vsel %vm531_vm11, %v549_v9, 0.0 }
  0x68   :  { %v1431_v21 = vadd.f32 %v550_v48, %v482_v47  ;;  %v1433_v37 = vadd.f32 %v551_v15, %v483_v4  ;;  %v1435_v53 = vadd.f32 %v552_v16, %v510_v32  ;;  %v1437_v24 = vadd.f32 %v553_v20, %v511_v8 }
  0x69   :  { %v267_v29 = vadd.f32 %v1169_v63, %v168_v45  ;;  %v366_v30 = vsel %vm315_vm12, %v1232_v28, 0.0  ;;  %vm116_vm13 = vcmp.eq.s32.totalorder %v1072_v12, %v1177_v2  ;;  %vm314_vm14 = vcmp.eq.s32.totalorder %v1072_v12, %v1201_v11  ;;  %v436_v11 = vld [vmem:[#allocation5 + $0x40] sm:$0xff] }
  0x6a   :  { %v167_v25 = vsel %vm116_vm13, %v1198_v10, 0.0  ;;  %v365_v17 = vsel %vm314_vm14, %v1229_v27, 0.0  ;;  %vm115_vm15 = vcmp.eq.s32.totalorder %v1072_v12, %v1184_v5  ;;  %vm313_vm0 = vcmp.eq.s32.totalorder %v1072_v12, %v1209_v14  ;;  %v429_v5 = vld [vmem:[#allocation5 + $0x8] sm:$0xff]  ;;  %v438_v14 = vld [vmem:[#allocation5 + $0x50] sm:$0xff]  ;;  %v431_v27 = vld [vmem:[#allocation5 + $0x18] sm:$0xff] }
  0x6b   :  { %v398_v33 = vadd.f32 %v366_v30, %v267_v29  ;;  %v397_v63 = vadd.f32 %v365_v17, %v167_v25  ;;  %v166_v54 = vsel %vm115_vm15, %v1206_v13, 0.0  ;;  %v364_v39 = vsel %vm313_vm0, %v1232_v28, 0.0  ;;  %v437_v10 = vld [vmem:[#allocation5 + $0x48] sm:$0xff]  ;;  %v430_v13 = vld [vmem:[#allocation5 + $0x10] sm:$0xff]  ;;  %v439_v28 = vld [vmem:[#allocation5 + $0x58] sm:$0xff] }
  0x6c   :  { %v396_v2 = vadd.f32 %v364_v39, %v166_v54  ;;  %v1476_v61 = vsub.s32 1, %v1072_v12  ;;  %v1481_v62 = vsub.s32 0, %v1072_v12  ;;  %v746_v7 = vrot.slane %v1431_v21, %v1084_v22 }
  0x6d   :  { %587 = vmatpush1.msra.mxu0 %v398_v33  ;;  %965 = vmatpush1.msra.mxu1 %v398_v33  ;;  %v1496_v32 = vsub.s32 4, %v1072_v12  ;;  %v1499_v58 = vsub.s32 5, %v1072_v12  ;;  %v750_v48 = vrot.slane %v1433_v37, %v1084_v22  ;;  %v758_v15 = vrot.slane %v1431_v21, %v1078_v18 }
  0x6e   :  { %588 = vmatprep.subr.mxu0 %v397_v63  ;;  %950 = vmatprep.subr.mxu1 %v397_v63  ;;  %v734_v60 = vrot.slane %v1431_v21, %v1476_v61  ;;  %v722_v4 = vrot.slane %v1431_v21, %v1481_v62  ;;  %v738_v6 = vrot.slane %v1433_v37, %v1476_v61 }
  0x6f   :  { %589 = vmatpush1.msra.mxu0 %v396_v2  ;;  %966 = vmatpush1.msra.mxu1 %v396_v2  ;;  %v726_v9 = vrot.slane %v1433_v37, %v1481_v62  ;;  %v762_v16 = vrot.slane %v1433_v37, %v1078_v18  ;;  %v770_v17 = vrot.slane %v1431_v21, %v1496_v32 }
  0x70   :  { %623 = vmatmul.mubr.f32.vlgmr.msra.gmra.mxu0 %v428_v34  ;;  %671 = vmatmul.mubr.f32.vlgmr.msra.gmra.mxu1 %v436_v11  ;;  %v774_v63 = vrot.slane %v1433_v37, %v1496_v32  ;;  %v782_v54 = vrot.slane %v1431_v21, %v1499_v58 }
  0x71   :  { %628 = vmatprep.mubr.f32.mxu0 %v1047_v0  ;;  %676 = vmatprep.mubr.f32.mxu1 %v1047_v0 }
  0x74   :  { %629 = vmatmul.mubr.f32.gmra.mxu0 %v429_v5  ;;  %677 = vmatmul.mubr.f32.gmra.mxu1 %v437_v10  ;;  %v786_v10 = vrot.slane %v1433_v37, %v1499_v58 }
  0x75   :  { %634 = vmatprep.mubr.f32.mxu0 %v1047_v0  ;;  %682 = vmatprep.mubr.f32.mxu1 %v1047_v0 }
  0x78   :  { %635 = vmatmul.mubr.f32.gmra.mxu0 %v430_v13  ;;  %683 = vmatmul.mubr.f32.gmra.mxu1 %v438_v14  ;;  %v794_v13 = vrot.slane %v1431_v21, %v1094_v26 }
  0x79   :  { %640 = vmatprep.mubr.f32.mxu0 %v1047_v0  ;;  %688 = vmatprep.mubr.f32.mxu1 %v1047_v0 }
  0x7c   :  { %641 = vmatmul.mubr.f32.gmra.mxu0 %v431_v27  ;;  %689 = vmatmul.mubr.f32.gmra.mxu1 %v439_v28 }
  0x7d   :  { %646 = vmatprep.mubr.f32.mxu0 %v1047_v0  ;;  %694 = vmatprep.mubr.f32.mxu1 %v1047_v0 }
  0x80   :  { %647 = vmatmul.mubr.f32.gmra.mxu0 %v432_v35  ;;  %695 = vmatmul.mubr.f32.gmra.mxu1 %v440_v23 }
  0x81   :  { %652 = vmatprep.mubr.f32.mxu0 %v1047_v0  ;;  %700 = vmatprep.mubr.f32.mxu1 %v1047_v0 }
  0x84   :  { %653 = vmatmul.mubr.f32.gmra.mxu0 %v433_v36  ;;  %701 = vmatmul.mubr.f32.gmra.mxu1 %v441_v55  ;;  %v798_v55 = vrot.slane %v1433_v37, %v1094_v26 }
  0x85   :  { %658 = vmatprep.mubr.f32.mxu0 %v1047_v0  ;;  %706 = vmatprep.mubr.f32.mxu1 %v1047_v0 }
  0x88   :  { %659 = vmatmul.mubr.f32.gmra.mxu0 %v434_v38  ;;  %707 = vmatmul.mubr.f32.gmra.mxu1 %v442_v44 }
  0x89   :  { %664 = vmatprep.mubr.f32.mxu0 %v1047_v0  ;;  %712 = vmatprep.mubr.f32.mxu1 %v1047_v0 }
  0x8c   :  { %665 = vmatmul.mubr.f32.gmra.mxu0 %v435_v40  ;;  %713 = vmatmul.mubr.f32.gmra.mxu1 %v443_v41 }
 0x130   :  { %v624_v42 = vpop.f32.mrf.mxu0  ;;  %v1467_v43 = vpop.f32.mrf.mxu1 }
 0x131   :  { %v727_v12 = vmul.f32 %v722_v4, %v624_v42 }
 0x132   :  { %v626_v56 = vpop.f32.mrf.mxu0  ;;  %v1469_v31 = vpop.f32.mrf.mxu1 }
 0x133   :  { %v728_v39 = vmul.f32 %v726_v9, %v626_v56  ;;  %v806_v56 = vrot.slane %v1431_v21, %v1081_v19  ;;  %v810_v9 = vrot.slane %v1433_v37, %v1081_v19 }
 0x134   :  { %v630_v46 = vpop.f32.mrf.mxu0  ;;  %v1471_v49 = vpop.f32.mrf.mxu1 }
 0x135   :  { %v739_v45 = vmul.f32 %v734_v60, %v630_v46 }
 0x136   :  { %v632_v57 = vpop.f32.mrf.mxu0  ;;  %v1473_v51 = vpop.f32.mrf.mxu1 }
 0x137   :  { %v740_v30 = vmul.f32 %v738_v6, %v632_v57  ;;  %v741_v2 = vadd.f32 %v739_v45, %v727_v12  ;;  %v822_v45 = vrot.slane %v1437_v24, %v1481_v62 }
 0x138   :  { %v636_v50 = vpop.f32.mrf.mxu0  ;;  %v1478_v0 = vpop.f32.mrf.mxu1 }
 0x139   :  { %v751_v25 = vmul.f32 %v746_v7, %v636_v50  ;;  %v742_v27 = vadd.f32 %v740_v30, %v728_v39  ;;  %v834_v30 = vrot.slane %v1437_v24, %v1476_v61  ;;  %v854_v39 = vrot.slane %v1435_v53, %v1078_v18 }
 0x13a   :  { %v638_v1 = vpop.f32.mrf.mxu0  ;;  %v1483_v59 = vpop.f32.mrf.mxu1 }
 0x13b   :  { %v752_v34 = vmul.f32 %v750_v48, %v638_v1  ;;  %v753_v28 = vadd.f32 %v751_v25, %v741_v2  ;;  %v842_v25 = vrot.slane %v1435_v53, %v1084_v22 }
 0x13c   :  { %v642_v3 = vpop.f32.mrf.mxu0  ;;  %v1487_v47 = vpop.f32.mrf.mxu1 }
 0x13d   :  { %v763_v11 = vmul.f32 %v758_v15, %v642_v3  ;;  %v754_v38 = vadd.f32 %v752_v34, %v742_v27  ;;  %v818_v3 = vrot.slane %v1435_v53, %v1481_v62  ;;  %v830_v15 = vrot.slane %v1435_v53, %v1476_v61 }
 0x13e   :  { %v644_v8 = vpop.f32.mrf.mxu0  ;;  %v1501_v52 = vpop.f32.mrf.mxu1  ;;  %v824_v34 = vmul.f32 %v822_v45, %v1469_v31  ;;  %v878_v31 = vrot.slane %v1435_v53, %v1499_v58 }
 0x13f   :  { %v764_v35 = vmul.f32 %v762_v16, %v644_v8  ;;  %v765_v44 = vadd.f32 %v763_v11, %v753_v28  ;;  %v823_v37 = vmul.f32 %v818_v3, %v1467_v43  ;;  %v835_v61 = vmul.f32 %v830_v15, %v1471_v49 }
 0x140   :  { %v648_v20 = vpop.f32.mrf.mxu0  ;;  %v1511_v29 = vpop.f32.mrf.mxu1  ;;  %v866_v43 = vrot.slane %v1435_v53, %v1496_v32 }
 0x141   :  { %v775_v23 = vmul.f32 %v770_v17, %v648_v20  ;;  %v766_v57 = vadd.f32 %v764_v35, %v754_v38  ;;  %v870_v35 = vrot.slane %v1437_v24, %v1496_v32  ;;  %v902_v38 = vrot.slane %v1435_v53, %v1081_v19 }
 0x142   :  { %v650_v33 = vpop.f32.mrf.mxu0  ;;  %v1523_v14 = vpop.f32.mrf.mxu1 }
 0x143   :  { %v776_v40 = vmul.f32 %v774_v63, %v650_v33  ;;  %v777_v50 = vadd.f32 %v775_v23, %v765_v44 }
 0x144   :  { %v654_v5 = vpop.f32.mrf.mxu0  ;;  %v702_v46 = vpop.f32.mrf.mxu1 }
 0x145   :  { %v787_v41 = vmul.f32 %v782_v54, %v654_v5  ;;  %v778_v6 = vadd.f32 %v776_v40, %v766_v57  ;;  %v846_v54 = vrot.slane %v1437_v24, %v1084_v22  ;;  %v847_v22 = vmul.f32 %v842_v25, %v1478_v0 }
 0x146   :  { %v656_v36 = vpop.f32.mrf.mxu0  ;;  %v704_v21 = vpop.f32.mrf.mxu1  ;;  %v890_v0 = vrot.slane %v1435_v53, %v1094_v26  ;;  %v871_v40 = vmul.f32 %v866_v43, %v1511_v29  ;;  %v883_v57 = vmul.f32 %v878_v31, %v702_v46 }
 0x147   :  { %v788_v1 = vmul.f32 %v786_v10, %v656_v36  ;;  %v789_v7 = vadd.f32 %v787_v41, %v777_v50  ;;  %v858_v10 = vrot.slane %v1437_v24, %v1078_v18  ;;  %v848_v23 = vmul.f32 %v846_v54, %v1483_v59 }
 0x148   :  { %v660_v42 = vpop.f32.mrf.mxu0  ;;  %v708_v2 = vpop.f32.mrf.mxu1  ;;  %v859_v18 = vmul.f32 %v854_v39, %v1487_v47  ;;  %v894_v59 = vrot.slane %v1437_v24, %v1094_v26 }
 0x149   :  { %v799_v60 = vmul.f32 %v794_v13, %v660_v42  ;;  %v790_v16 = vadd.f32 %v788_v1, %v778_v6  ;;  %v836_v13 = vmul.f32 %v834_v30, %v1473_v51  ;;  %v882_v51 = vrot.slane %v1437_v24, %v1499_v58 }
 0x14a   :  { %v662_v4 = vpop.f32.mrf.mxu0  ;;  %v710_v49 = vpop.f32.mrf.mxu1  ;;  %v860_v32 = vmul.f32 %v858_v10, %v1501_v52  ;;  %v872_v58 = vmul.f32 %v870_v35, %v1523_v14  ;;  %v906_v1 = vrot.slane %v1437_v24, %v1081_v19  ;;  %v895_v52 = vmul.f32 %v890_v0, %v708_v2 }
 0x14b   :  { %v800_v8 = vmul.f32 %v798_v55, %v662_v4  ;;  %v801_v20 = vadd.f32 %v799_v60, %v789_v7  ;;  %v884_v50 = vmul.f32 %v882_v51, %v704_v21  ;;  %v896_v7 = vmul.f32 %v894_v59, %v710_v49 }
 0x14c   :  { %v666_v48 = vpop.f32.mrf.mxu0  ;;  %v714_v47 = vpop.f32.mrf.mxu1 }
 0x14d   :  { %v811_v12 = vmul.f32 %v806_v56, %v666_v48  ;;  %v802_v33 = vadd.f32 %v800_v8, %v790_v16  ;;  %v907_v3 = vmul.f32 %v902_v38, %v714_v47 }
 0x14e   :  { %v668_v17 = vpop.f32.mrf.mxu0  ;;  %v716_v4 = vpop.f32.mrf.mxu1 }
 0x14f   :  { %v813_v63 = vadd.f32 %v811_v12, %v801_v20  ;;  %v812_v62 = vmul.f32 %v810_v9, %v668_v17  ;;  %v908_v9 = vmul.f32 %v906_v1, %v716_v4 }
 0x151   :  { %v825_v11 = vadd.f32 %v823_v37, %v813_v63  ;;  %v814_v5 = vadd.f32 %v812_v62, %v802_v33 }
 0x153   :  { %v837_v27 = vadd.f32 %v835_v61, %v825_v11  ;;  %v826_v28 = vadd.f32 %v824_v34, %v814_v5 }
 0x155   :  { %v838_v36 = vadd.f32 %v836_v13, %v826_v28  ;;  %v849_v55 = vadd.f32 %v847_v22, %v837_v27 }
 0x157   :  { %v861_v44 = vadd.f32 %v859_v18, %v849_v55  ;;  %v850_v41 = vadd.f32 %v848_v23, %v838_v36 }
 0x159   :  { %v873_v42 = vadd.f32 %v871_v40, %v861_v44  ;;  %v862_v56 = vadd.f32 %v860_v32, %v850_v41 }
 0x15b   :  { %v874_v53 = vadd.f32 %v872_v58, %v862_v56  ;;  %v885_v60 = vadd.f32 %v883_v57, %v873_v42 }
 0x15d   :  { %v886_v29 = vadd.f32 %v884_v50, %v874_v53  ;;  %v897_v6 = vadd.f32 %v895_v52, %v885_v60 }
 0x15f   :  { %v898_v26 = vadd.f32 %v896_v7, %v886_v29  ;;  %v909_v8 = vadd.f32 %v907_v3, %v897_v6 }
 0x161   :  { %911 = vst [vmem:[#allocation7] sm:$0xff] %v909_v8  ;;  %v910_v14 = vadd.f32 %v908_v9, %v898_v26 }
 0x163   :  { %912 = vst [vmem:[#allocation7 + $0x8] sm:$0xff] %v910_v14 }
 0x164   :  { %1028 = shalt.err (!%p1025_p0)
}
 0x165   :  { %922 = dma.vmem_to_hbm [thread:$0]  %s920_s1, 256, %s1578_s2, [#allocation4]  }
 0x166   :  { %1041 = dma.done.wait [#allocation4], 256  }
 0x167   :  { %1042 = vsyncadd [#allocation4], 4294967040 }
 0x168   :  { %926 = vsyncpa [#allocation3], 1 }
 0x169   :  { %927 = vsyncpa [#allocation6], 1 }
 0x16a   :  { %928 = vsyncpa [#allocation4], 1 }

// kernel: tpu_custom_call.1
= control target key start
LH: loop header
LB: loop body
LE: loop exit
PB: predicated region body
PF: predicated region fallthrough
CT: control target
= control target key end

     0   :  { %7 = vsyncpa [#allocation3], 0  ;;  %s1576_s0 = inlined_call_operand.hbm [shape: f32[4,256], index: 0, kind: input, shape index: {}]   ;;  %s1577_s1 = inlined_call_operand.hbm [shape: f32[128,128], index: 1, kind: input, shape index: {}]   ;;  %s1578_s2 = inlined_call_operand.hbm [shape: f32[8,256], index: 2, kind: output, shape index: {}]  }
   0x1   :  { %8 = vsyncpa [#allocation6], 0 }
   0x2   :  { %9 = vsyncpa [#allocation4], 0  ;;  %s1043_s9 = smov [#allocation2]   ;;  %s1044_s11 = smov [#allocation5]  }
   0x3   :  { %s16_s10 = sshll.u32 %s1043_s9, 4  ;;  %s25_s12 = sshll.u32 %s1044_s11, 4  ;;  %s17_s10 = int_to_ptr.vmem [resolvable:$true] %s16_s10  ;;  %s26_s12 = int_to_ptr.vmem [resolvable:$true] %s25_s12 }
   0x4   :  { %s985_s13 = scalar_lea.vmem %s17_s10, 128  ;;  %p990_p1 = scmp.lt.s32.totalorder %s17_s10, %s17_s10 }
   0x5   :  { %p986_p0 = scmp.ne.s32.totalorder %s17_s10, %s985_s13  ;;  %p991_p2 = scmp.lt.s32.totalorder %s985_s13, %s985_s13 }
   0x7   :  { %p992_p3 = por %p991_p2, %p990_p1 }
   0x9   :  { %p993_p4 = pnand %p992_p3, %p986_p0 }
   0xb   :  { %996 = shalt.err (!%p993_p4)
}
   0xc   :  { %19 = dma.hbm_to_vmem [thread:$0]  %s1576_s0, 128, %s17_s10, [#allocation3]  }
   0xd   :  { %s1005_s16 = scalar_lea.vmem %s26_s12, 2048  ;;  %p1010_p6 = scmp.lt.s32.totalorder %s26_s12, %s26_s12 }
   0xe   :  { %p1006_p5 = scmp.ne.s32.totalorder %s26_s12, %s1005_s16  ;;  %p1011_p7 = scmp.lt.s32.totalorder %s1005_s16, %s1005_s16 }
  0x10   :  { %p1012_p8 = por %p1011_p7, %p1010_p6 }
  0x12   :  { %p1013_p9 = pnand %p1012_p8, %p1006_p5 }
  0x14   :  { %1016 = shalt.err (!%p1013_p9)
}
  0x15   :  { %s1045_s17 = smov 128   ;;  %s1046_s18 = smov 8  }
  0x16   :  { %31 = dma.hbm_to_vmem [thread:$0]  %s1577_s1, 2048, %s26_s12, [#allocation6], %s1045_s17, %s1045_s17, %s1046_s18  }
  0x17   :  { %1037 = dma.done.wait [#allocation3], 128  }
  0x18   :  { %1038 = vsyncadd [#allocation3], 4294967168 }
  0x19   :  { %1039 = dma.done.wait [#allocation6], 2048  }
  0x1a   :  { %1040 = vsyncadd [#allocation6], 4294965248  ;;  %v1047_v0 = vmov 0.0   ;;  %v38_v1 = vld [vmem:[#allocation2] sm:$0xff]  ;;  %v82_v7 = vlaneseq  ;;  %s1048_s0 = smov [#allocation7]  }
  0x1b   :  { %622 = vmatprep.mubr.f32.mxu0 %v1047_v0  ;;  %670 = vmatprep.mubr.f32.mxu1 %v1047_v0  ;;  %v39_v2 = vmul.f32 0.5, %v38_v1  ;;  %vm46_vm0 = vcmp.lt.f32.partialorder %v38_v1, 0.0  ;;  %s919_s1 = sshll.u32 %s1048_s0, 4  ;;  %s920_s1 = int_to_ptr.vmem [resolvable:$true] %s919_s1 }
  0x1c   :  { %v1072_v12 = vshrl.u32 %v82_v7, 7  ;;  %s1017_s21 = scalar_lea.vmem %s920_s1, 256  ;;  %p1022_p11 = scmp.lt.s32.totalorder %s920_s1, %s920_s1 }
  0x1d   :  { %v41_v3 = vrot.slane %v39_v2, 6  ;;  %p1018_p10 = scmp.ne.s32.totalorder %s920_s1, %s1017_s21  ;;  %p1023_p12 = scmp.lt.s32.totalorder %s1017_s21, %s1017_s21 }
  0x1e   :  { %v1075_v17 = vadd.s32 120, %v1072_v12  ;;  %v1078_v18 = vsub.s32 3, %v1072_v12  ;;  %v1081_v19 = vsub.s32 7, %v1072_v12  ;;  %v1084_v22 = vsub.s32 2, %v1072_v12 }
  0x1f   :  { %v42_v4 = vrot.slane %v41_v3, 4  ;;  %v1087_v23 = vadd.s32 112, %v1072_v12  ;;  %v1091_v25 = vadd.s32 8, %v1072_v12  ;;  %v1094_v26 = vsub.s32 6, %v1072_v12  ;;  %p1024_p13 = por %p1023_p12, %p1022_p11 }
  0x20   :  { %v1099_v31 = vadd.s32 104, %v1072_v12  ;;  %v1102_v32 = vadd.s32 96, %v1072_v12  ;;  %v1107_v37 = vadd.s32 88, %v1072_v12  ;;  %v1111_v39 = vadd.s32 80, %v1072_v12 }
  0x21   :  { %v44_v5 = vsub.f32 %v38_v1, %v42_v4  ;;  %v45_v6 = vadd.f32 %v42_v4, %v38_v1  ;;  %vm199_vm2 = vcmp.eq.s32.totalorder %v1091_v25, 15  ;;  %v1117_v44 = vadd.s32 72, %v1072_v12  ;;  %p1025_p0 = pnand %p1024_p13, %p1018_p10 }
  0x22   :  { %v1124_v46 = vadd.s32 64, %v1072_v12  ;;  %v1127_v47 = vadd.s32 56, %v1072_v12  ;;  %v1137_v52 = vadd.s32 48, %v1072_v12  ;;  %v1140_v53 = vadd.s32 40, %v1072_v12 }
  0x23   :  { %v48_v8 = vrot.slane %v45_v6, 6  ;;  %v51_v9 = vrot.slane %v44_v5, 6  ;;  %v1143_v54 = vadd.s32 32, %v1072_v12  ;;  %v1146_v55 = vadd.s32 24, %v1072_v12 }
  0x24   :  { %v1149_v56 = vadd.s32 16, %v1072_v12 }
  0x25   :  { %v53_v10 = vsel %vm46_vm0, %v48_v8, %v51_v9  ;;  %v54_v11 = vsel %vm46_vm0, %v51_v9, %v48_v8 }
  0x26   :  { %v55_v13 = vfloor.f32 %v53_v10  ;;  %v57_v14 = vfloor.f32 %v54_v11 }
  0x28   :  { %v56_v15 = vsub.f32 %v53_v10, %v55_v13  ;;  %v58_v16 = vsub.f32 %v54_v11, %v57_v14 }
  0x2a   :  { %v62_v20 = vmul.f32 16.0, %v58_v16  ;;  %v932_v21 = vadd.f32 -0.0625, %v56_v15  ;;  %vm59_vm1 = vcmp.gt.f32.partialorder %v56_v15, %v58_v16 }
  0x2b   :  { %v929_v24 = vsel %vm59_vm1, 1.0, %v1047_v0 }
  0x2c   :  { %v930_v27 = vadd.f32 -0.5, %v62_v20  ;;  %v72_v28 = vmul.f32 16.0, %v932_v21  ;;  %v222_v29 = vrot.slane %v929_v24, %v1081_v19  ;;  %v489_v30 = vrot.slane %v929_v24, %v1084_v22 }
  0x2d   :  { %v493_v33 = vrot.slane %v929_v24, %v1094_v26  ;;  %v218_v34 = vrot.slane %v929_v24, %v1078_v18 }
  0x2e   :  { %v64_v35 = vfloor.f32 %v930_v27  ;;  %v933_v36 = vadd.f32 -0.5, %v72_v28  ;;  %v499_v38 = vrot.slane %v489_v30, %v1084_v22  ;;  %v232_v40 = vrot.slane %v222_v29, %v1078_v18 }
  0x2f   :  { %v503_v41 = vrot.slane %v493_v33, %v1084_v22  ;;  %v228_v49 = vrot.slane %v218_v34, %v1078_v18 }
  0x30   :  { %v967_v42 = vtrunc.f32 %v64_v35  ;;  %v74_v43 = vfloor.f32 %v933_v36  ;;  %v1121_v45 = vsel %vm199_vm2, %v499_v38, 0.0  ;;  %v1153_v57 = vsel %vm199_vm2, %v232_v40, 0.0 }
  0x31   :  { %v1131_v48 = vsel %vm199_vm2, %v503_v41, 0.0  ;;  %v1169_v63 = vsel %vm199_vm2, %v228_v49, 0.0 }
  0x32   :  { %v1134_v50 = vcvt.f32.s32 %v967_v42  ;;  %v969_v51 = vtrunc.f32 %v74_v43 }
  0x34   :  { %vm66_vm3 = vcmp.ge.s32.totalorder %v1134_v50, 0  ;;  %vm67_vm4 = vcmp.lt.s32.totalorder %v1134_v50, 16  ;;  %v1157_v58 = vcvt.f32.s32 %v969_v51  ;;  %v106_v59 = vrot.slane %v1134_v50, %v1081_v19 }
  0x35   :  { %vm68_vm5 = vmand %vm66_vm3, %vm67_vm4  ;;  %v102_v60 = vrot.slane %v1134_v50, %v1078_v18  ;;  %v447_v61 = vrot.slane %v1134_v50, %v1084_v22  ;;  %v451_v62 = vrot.slane %v1134_v50, %v1094_v26 }
  0x36   :  { %v1172_v1 = vsel %vm68_vm5, 1.0, %v1047_v0  ;;  %vm76_vm6 = vcmp.ge.s32.totalorder %v1157_v58, 0  ;;  %vm77_vm7 = vcmp.lt.s32.totalorder %v1157_v58, 16  ;;  %v1177_v2 = vrot.slane %v106_v59, %v1078_v18 }
  0x37   :  { %vm78_vm8 = vmand %vm76_vm6, %vm77_vm7  ;;  %v155_v3 = vrot.slane %v1172_v1, %v1081_v19  ;;  %v304_v4 = vrot.slane %v1157_v58, %v1081_v19  ;;  %v1184_v5 = vrot.slane %v102_v60, %v1078_v18  ;;  %v151_v6 = vrot.slane %v1172_v1, %v1078_v18 }
  0x38   :  { %v934_v7 = vsel %vm78_vm8, 1.0, %v1047_v0  ;;  %vm146_vm9 = vcmp.eq.s32.totalorder %v1075_v17, %v1177_v2  ;;  %v300_v8 = vrot.slane %v1157_v58, %v1078_v18  ;;  %vm144_vm10 = vcmp.eq.s32.totalorder %v1087_v23, %v1177_v2 }
  0x39   :  { %v1195_v9 = vsub.f32 0.0, %v934_v7  ;;  %v1198_v10 = vrot.slane %v155_v3, %v1078_v18  ;;  %v1201_v11 = vrot.slane %v304_v4, %v1078_v18  ;;  %vm145_vm11 = vcmp.eq.s32.totalorder %v1075_v17, %v1184_v5 }
  0x3a   :  { %v1206_v13 = vrot.slane %v151_v6, %v1078_v18  ;;  %v1209_v14 = vrot.slane %v300_v8, %v1078_v18  ;;  %vm143_vm12 = vcmp.eq.s32.totalorder %v1087_v23, %v1184_v5  ;;  %vm142_vm13 = vcmp.eq.s32.totalorder %v1099_v31, %v1177_v2 }
  0x3b   :  { %v197_v15 = vsel %vm146_vm9, %v1198_v10, 0.0  ;;  %vm344_vm14 = vcmp.eq.s32.totalorder %v1075_v17, %v1201_v11  ;;  %v353_v16 = vrot.slane %v1195_v9, %v1081_v19  ;;  %v349_v20 = vrot.slane %v1195_v9, %v1078_v18 }
  0x3c   :  { %v196_v21 = vsel %vm145_vm11, %v1206_v13, 0.0  ;;  %vm343_vm15 = vcmp.eq.s32.totalorder %v1075_v17, %v1209_v14  ;;  %v195_v24 = vsel %vm144_vm10, %v1198_v10, 0.0  ;;  %vm342_vm0 = vcmp.eq.s32.totalorder %v1087_v23, %v1201_v11 }
  0x3d   :  { %v1229_v27 = vrot.slane %v353_v16, %v1078_v18  ;;  %v1232_v28 = vrot.slane %v349_v20, %v1078_v18  ;;  %v194_v29 = vsel %vm143_vm12, %v1206_v13, 0.0  ;;  %vm341_vm1 = vcmp.eq.s32.totalorder %v1087_v23, %v1209_v14 }
  0x3e   :  { %v193_v30 = vsel %vm142_vm13, %v1198_v10, 0.0  ;;  %vm340_vm2 = vcmp.eq.s32.totalorder %v1099_v31, %v1201_v11  ;;  %vm141_vm3 = vcmp.eq.s32.totalorder %v1099_v31, %v1184_v5  ;;  %vm339_vm4 = vcmp.eq.s32.totalorder %v1099_v31, %v1209_v14 }
  0x3f   :  { %v395_v17 = vsel %vm344_vm14, %v1229_v27, 0.0  ;;  %v394_v33 = vsel %vm343_vm15, %v1232_v28, 0.0  ;;  %v393_v34 = vsel %vm342_vm0, %v1229_v27, 0.0  ;;  %v392_v35 = vsel %vm341_vm1, %v1232_v28, 0.0 }
  0x40   :  { %v427_v23 = vadd.f32 %v395_v17, %v197_v15  ;;  %v426_v36 = vadd.f32 %v394_v33, %v196_v21  ;;  %v425_v38 = vadd.f32 %v393_v34, %v195_v24  ;;  %v424_v40 = vadd.f32 %v392_v35, %v194_v29 }
  0x41   :  { %v391_v41 = vsel %vm340_vm2, %v1229_v27, 0.0  ;;  %v192_v42 = vsel %vm141_vm3, %v1206_v13, 0.0  ;;  %v390_v43 = vsel %vm339_vm4, %v1232_v28, 0.0  ;;  %vm140_vm5 = vcmp.eq.s32.totalorder %v1102_v32, %v1177_v2 }
  0x42   :  { %558 = vmatprep.subr.mxu0 %v427_v23  ;;  %v423_v31 = vadd.f32 %v391_v41, %v193_v30  ;;  %v422_v49 = vadd.f32 %v390_v43, %v192_v42  ;;  %v191_v51 = vsel %vm140_vm5, %v1198_v10, 0.0  ;;  %vm338_vm6 = vcmp.eq.s32.totalorder %v1102_v32, %v1201_v11  ;;  %935 = vmatprep.subr.mxu1 %v427_v23 }
  0x43   :  { %559 = vmatpush1.msra.mxu0 %v426_v36  ;;  %v389_v59 = vsel %vm338_vm6, %v1229_v27, 0.0  ;;  %vm139_vm7 = vcmp.eq.s32.totalorder %v1102_v32, %v1184_v5  ;;  %vm337_vm8 = vcmp.eq.s32.totalorder %v1102_v32, %v1209_v14  ;;  %vm138_vm9 = vcmp.eq.s32.totalorder %v1107_v37, %v1177_v2  ;;  %951 = vmatpush1.msra.mxu1 %v426_v36 }
  0x44   :  { %560 = vmatprep.subr.mxu0 %v425_v38  ;;  %v421_v60 = vadd.f32 %v389_v59, %v191_v51  ;;  %v190_v3 = vsel %vm139_vm7, %v1206_v13, 0.0  ;;  %v388_v4 = vsel %vm337_vm8, %v1232_v28, 0.0  ;;  %v189_v6 = vsel %vm138_vm9, %v1198_v10, 0.0  ;;  %936 = vmatprep.subr.mxu1 %v425_v38 }
  0x45   :  { %561 = vmatpush1.msra.mxu0 %v424_v40  ;;  %v420_v7 = vadd.f32 %v388_v4, %v190_v3  ;;  %vm336_vm10 = vcmp.eq.s32.totalorder %v1107_v37, %v1201_v11  ;;  %vm137_vm11 = vcmp.eq.s32.totalorder %v1107_v37, %v1184_v5  ;;  %vm335_vm12 = vcmp.eq.s32.totalorder %v1107_v37, %v1209_v14 }
  0x46   :  { %562 = vmatprep.subr.mxu0 %v423_v31  ;;  %v387_v32 = vsel %vm336_vm10, %v1229_v27, 0.0  ;;  %v188_v8 = vsel %vm137_vm11, %v1206_v13, 0.0  ;;  %v386_v15 = vsel %vm335_vm12, %v1232_v28, 0.0  ;;  %vm136_vm13 = vcmp.eq.s32.totalorder %v1111_v39, %v1177_v2  ;;  %952 = vmatpush1.msra.mxu1 %v424_v40 }
  0x47   :  { %563 = vmatpush1.msra.mxu0 %v422_v49  ;;  %v419_v16 = vadd.f32 %v387_v32, %v189_v6  ;;  %v418_v20 = vadd.f32 %v386_v15, %v188_v8  ;;  %v187_v21 = vsel %vm136_vm13, %v1198_v10, 0.0  ;;  %vm334_vm14 = vcmp.eq.s32.totalorder %v1111_v39, %v1201_v11  ;;  %937 = vmatprep.subr.mxu1 %v423_v31 }
  0x48   :  { %564 = vmatprep.subr.mxu0 %v421_v60  ;;  %v385_v37 = vsel %vm334_vm14, %v1229_v27, 0.0  ;;  %vm135_vm15 = vcmp.eq.s32.totalorder %v1111_v39, %v1184_v5  ;;  %vm333_vm0 = vcmp.eq.s32.totalorder %v1111_v39, %v1209_v14  ;;  %vm134_vm1 = vcmp.eq.s32.totalorder %v1117_v44, %v1177_v2  ;;  %953 = vmatpush1.msra.mxu1 %v422_v49 }
  0x49   :  { %565 = vmatpush1.msra.mxu0 %v420_v7  ;;  %v417_v24 = vadd.f32 %v385_v37, %v187_v21  ;;  %v186_v29 = vsel %vm135_vm15, %v1206_v13, 0.0  ;;  %v384_v30 = vsel %vm333_vm0, %v1232_v28, 0.0  ;;  %v185_v17 = vsel %vm134_vm1, %v1198_v10, 0.0  ;;  %938 = vmatprep.subr.mxu1 %v421_v60 }
  0x4a   :  { %566 = vmatprep.subr.mxu0 %v419_v16  ;;  %v416_v33 = vadd.f32 %v384_v30, %v186_v29  ;;  %vm332_vm2 = vcmp.eq.s32.totalorder %v1117_v44, %v1201_v11  ;;  %vm133_vm3 = vcmp.eq.s32.totalorder %v1117_v44, %v1184_v5  ;;  %vm331_vm4 = vcmp.eq.s32.totalorder %v1117_v44, %v1209_v14 }
  0x4b   :  { %567 = vmatpush1.msra.mxu0 %v418_v20  ;;  %v383_v39 = vsel %vm332_vm2, %v1229_v27, 0.0  ;;  %v184_v34 = vsel %vm133_vm3, %v1206_v13, 0.0  ;;  %v382_v35 = vsel %vm331_vm4, %v1232_v28, 0.0  ;;  %vm132_vm5 = vcmp.eq.s32.totalorder %v1124_v46, %v1177_v2  ;;  %954 = vmatpush1.msra.mxu1 %v420_v7 }
  0x4c   :  { %568 = vmatprep.subr.mxu0 %v417_v24  ;;  %v415_v23 = vadd.f32 %v383_v39, %v185_v17  ;;  %v414_v36 = vadd.f32 %v382_v35, %v184_v34  ;;  %v183_v38 = vsel %vm132_vm5, %v1198_v10, 0.0  ;;  %vm330_vm6 = vcmp.eq.s32.totalorder %v1124_v46, %v1201_v11  ;;  %939 = vmatprep.subr.mxu1 %v419_v16 }
  0x4d   :  { %569 = vmatpush1.msra.mxu0 %v416_v33  ;;  %v381_v44 = vsel %vm330_vm6, %v1229_v27, 0.0  ;;  %vm131_vm7 = vcmp.eq.s32.totalorder %v1124_v46, %v1184_v5  ;;  %vm329_vm8 = vcmp.eq.s32.totalorder %v1124_v46, %v1209_v14  ;;  %vm130_vm9 = vcmp.eq.s32.totalorder %v1127_v47, %v1177_v2  ;;  %955 = vmatpush1.msra.mxu1 %v418_v20 }
  0x4e   :  { %570 = vmatprep.subr.mxu0 %v415_v23  ;;  %v413_v40 = vadd.f32 %v381_v44, %v183_v38  ;;  %v182_v41 = vsel %vm131_vm7, %v1206_v13, 0.0  ;;  %v380_v42 = vsel %vm329_vm8, %v1232_v28, 0.0  ;;  %v181_v43 = vsel %vm130_vm9, %v1198_v10, 0.0  ;;  %940 = vmatprep.subr.mxu1 %v417_v24 }
  0x4f   :  { %571 = vmatpush1.msra.mxu0 %v414_v36  ;;  %v412_v31 = vadd.f32 %v380_v42, %v182_v41  ;;  %vm328_vm10 = vcmp.eq.s32.totalorder %v1127_v47, %v1201_v11  ;;  %vm129_vm11 = vcmp.eq.s32.totalorder %v1127_v47, %v1184_v5  ;;  %vm327_vm12 = vcmp.eq.s32.totalorder %v1127_v47, %v1209_v14 }
  0x50   :  { %572 = vmatprep.subr.mxu0 %v413_v40  ;;  %v379_v46 = vsel %vm328_vm10, %v1229_v27, 0.0  ;;  %v180_v49 = vsel %vm129_vm11, %v1206_v13, 0.0  ;;  %v378_v51 = vsel %vm327_vm12, %v1232_v28, 0.0  ;;  %vm128_vm13 = vcmp.eq.s32.totalorder %v1137_v52, %v1177_v2  ;;  %956 = vmatpush1.msra.mxu1 %v416_v33 }
  0x51   :  { %573 = vmatpush1.msra.mxu0 %v412_v31  ;;  %v411_v59 = vadd.f32 %v379_v46, %v181_v43  ;;  %v410_v60 = vadd.f32 %v378_v51, %v180_v49  ;;  %v179_v3 = vsel %vm128_vm13, %v1198_v10, 0.0  ;;  %vm326_vm14 = vcmp.eq.s32.totalorder %v1137_v52, %v1201_v11  ;;  %941 = vmatprep.subr.mxu1 %v415_v23 }
  0x52   :  { %v377_v47 = vsel %vm326_vm14, %v1229_v27, 0.0  ;;  %vm127_vm15 = vcmp.eq.s32.totalorder %v1137_v52, %v1184_v5  ;;  %vm325_vm0 = vcmp.eq.s32.totalorder %v1137_v52, %v1209_v14  ;;  %vm126_vm1 = vcmp.eq.s32.totalorder %v1140_v53, %v1177_v2  ;;  %957 = vmatpush1.msra.mxu1 %v414_v36 }
  0x53   :  { %574 = vmatprep.subr.mxu0 %v411_v59  ;;  %v409_v4 = vadd.f32 %v377_v47, %v179_v3  ;;  %v178_v6 = vsel %vm127_vm15, %v1206_v13, 0.0  ;;  %v376_v7 = vsel %vm325_vm0, %v1232_v28, 0.0  ;;  %v177_v32 = vsel %vm126_vm1, %v1198_v10, 0.0  ;;  %942 = vmatprep.subr.mxu1 %v413_v40 }
  0x54   :  { %575 = vmatpush1.msra.mxu0 %v410_v60  ;;  %v408_v8 = vadd.f32 %v376_v7, %v178_v6  ;;  %vm324_vm2 = vcmp.eq.s32.totalorder %v1140_v53, %v1201_v11  ;;  %vm125_vm3 = vcmp.eq.s32.totalorder %v1140_v53, %v1184_v5  ;;  %vm323_vm4 = vcmp.eq.s32.totalorder %v1140_v53, %v1209_v14 }
  0x55   :  { %576 = vmatprep.subr.mxu0 %v409_v4  ;;  %v375_v52 = vsel %vm324_vm2, %v1229_v27, 0.0  ;;  %v176_v15 = vsel %vm125_vm3, %v1206_v13, 0.0  ;;  %v374_v16 = vsel %vm323_vm4, %v1232_v28, 0.0  ;;  %vm124_vm5 = vcmp.eq.s32.totalorder %v1143_v54, %v1177_v2  ;;  %958 = vmatpush1.msra.mxu1 %v412_v31 }
  0x56   :  { %577 = vmatpush1.msra.mxu0 %v408_v8  ;;  %v407_v20 = vadd.f32 %v375_v52, %v177_v32  ;;  %v406_v21 = vadd.f32 %v374_v16, %v176_v15  ;;  %v175_v37 = vsel %vm124_vm5, %v1198_v10, 0.0  ;;  %vm322_vm6 = vcmp.eq.s32.totalorder %v1143_v54, %v1201_v11  ;;  %943 = vmatprep.subr.mxu1 %v411_v59 }
  0x57   :  { %v373_v53 = vsel %vm322_vm6, %v1229_v27, 0.0  ;;  %vm123_vm7 = vcmp.eq.s32.totalorder %v1143_v54, %v1184_v5  ;;  %vm321_vm8 = vcmp.eq.s32.totalorder %v1143_v54, %v1209_v14  ;;  %vm122_vm9 = vcmp.eq.s32.totalorder %v1146_v55, %v1177_v2  ;;  %959 = vmatpush1.msra.mxu1 %v410_v60 }
  0x58   :  { %578 = vmatprep.subr.mxu0 %v407_v20  ;;  %v405_v24 = vadd.f32 %v373_v53, %v175_v37  ;;  %v174_v29 = vsel %vm123_vm7, %v1206_v13, 0.0  ;;  %v372_v30 = vsel %vm321_vm8, %v1232_v28, 0.0  ;;  %v173_v17 = vsel %vm122_vm9, %v1198_v10, 0.0  ;;  %944 = vmatprep.subr.mxu1 %v409_v4 }
  0x59   :  { %579 = vmatpush1.msra.mxu0 %v406_v21  ;;  %v404_v33 = vadd.f32 %v372_v30, %v174_v29  ;;  %vm320_vm10 = vcmp.eq.s32.totalorder %v1146_v55, %v1201_v11  ;;  %vm121_vm11 = vcmp.eq.s32.totalorder %v1146_v55, %v1184_v5  ;;  %vm319_vm12 = vcmp.eq.s32.totalorder %v1146_v55, %v1209_v14 }
  0x5a   :  { %580 = vmatprep.subr.mxu0 %v405_v24  ;;  %v371_v54 = vsel %vm320_vm10, %v1229_v27, 0.0  ;;  %v172_v39 = vsel %vm121_vm11, %v1206_v13, 0.0  ;;  %v370_v34 = vsel %vm319_vm12, %v1232_v28, 0.0  ;;  %vm120_vm13 = vcmp.eq.s32.totalorder %v1149_v56, %v1177_v2  ;;  %960 = vmatpush1.msra.mxu1 %v408_v8 }
  0x5b   :  { %581 = vmatpush1.msra.mxu0 %v404_v33  ;;  %v403_v35 = vadd.f32 %v371_v54, %v173_v17  ;;  %v402_v23 = vadd.f32 %v370_v34, %v172_v39  ;;  %v171_v36 = vsel %vm120_vm13, %v1198_v10, 0.0  ;;  %vm318_vm14 = vcmp.eq.s32.totalorder %v1149_v56, %v1201_v11  ;;  %945 = vmatprep.subr.mxu1 %v407_v20  ;;  %v428_v34 = vld [vmem:[#allocation5] sm:$0xff] }
  0x5c   :  { %v369_v55 = vsel %vm318_vm14, %v1229_v27, 0.0  ;;  %vm119_vm15 = vcmp.eq.s32.totalorder %v1149_v56, %v1184_v5  ;;  %vm317_vm0 = vcmp.eq.s32.totalorder %v1149_v56, %v1209_v14  ;;  %vm118_vm1 = vcmp.eq.s32.totalorder %v1091_v25, %v1177_v2  ;;  %961 = vmatpush1.msra.mxu1 %v406_v21 }
  0x5d   :  { %582 = vmatprep.subr.mxu0 %v403_v35  ;;  %v401_v38 = vadd.f32 %v369_v55, %v171_v36  ;;  %v170_v44 = vsel %vm119_vm15, %v1206_v13, 0.0  ;;  %v368_v40 = vsel %vm317_vm0, %v1232_v28, 0.0  ;;  %v169_v41 = vsel %vm118_vm1, %v1198_v10, 0.0  ;;  %946 = vmatprep.subr.mxu1 %v405_v24  ;;  %v433_v36 = vld [vmem:[#allocation5 + $0x28] sm:$0xff] }
  0x5e   :  { %583 = vmatpush1.msra.mxu0 %v402_v23  ;;  %v400_v42 = vadd.f32 %v368_v40, %v170_v44  ;;  %v268_v43 = vadd.f32 %v1153_v57, %v169_v41  ;;  %vm316_vm2 = vcmp.eq.s32.totalorder %v1091_v25, %v1201_v11  ;;  %v455_v56 = vrot.slane %v447_v61, %v1084_v22  ;;  %v441_v55 = vld [vmem:[#allocation5 + $0x68] sm:$0xff]  ;;  %v442_v44 = vld [vmem:[#allocation5 + $0x70] sm:$0xff]  ;;  %v435_v40 = vld [vmem:[#allocation5 + $0x38] sm:$0xff] }
  0x5f   :  { %584 = vmatprep.subr.mxu0 %v401_v38  ;;  %v367_v31 = vsel %vm316_vm2, %v1229_v27, 0.0  ;;  %v459_v46 = vrot.slane %v451_v62, %v1084_v22  ;;  %v467_v49 = vrot.slane %v1172_v1, %v1084_v22  ;;  %v471_v57 = vrot.slane %v1172_v1, %v1094_v26  ;;  %962 = vmatpush1.msra.mxu1 %v404_v33  ;;  %v443_v41 = vld [vmem:[#allocation5 + $0x78] sm:$0xff] }
  0x60   :  { %585 = vmatpush1.msra.mxu0 %v400_v42  ;;  %v399_v51 = vadd.f32 %v367_v31, %v268_v43  ;;  %vm460_vm3 = vcmp.eq.s32.totalorder %v1072_v12, %v455_v56  ;;  %vm462_vm4 = vcmp.eq.s32.totalorder %v1091_v25, %v455_v56  ;;  %v515_v61 = vrot.slane %v1157_v58, %v1084_v22 }
  0x61   :  { %vm461_vm5 = vcmp.eq.s32.totalorder %v1072_v12, %v459_v46  ;;  %vm463_vm6 = vcmp.eq.s32.totalorder %v1091_v25, %v459_v46  ;;  %v477_v50 = vrot.slane %v467_v49, %v1084_v22  ;;  %v481_v62 = vrot.slane %v471_v57, %v1084_v22  ;;  %947 = vmatprep.subr.mxu1 %v403_v35  ;;  %v432_v35 = vld [vmem:[#allocation5 + $0x20] sm:$0xff] }
  0x62   :  { %v519_v1 = vrot.slane %v1157_v58, %v1094_v26  ;;  %v523_v59 = vrot.slane %v515_v61, %v1084_v22  ;;  %v535_v60 = vrot.slane %v1195_v9, %v1084_v22  ;;  %v539_v3 = vrot.slane %v1195_v9, %v1094_v26  ;;  %586 = vmatprep.subr.mxu0 %v399_v51 }
  0x63   :  { %v482_v47 = vsel %vm460_vm3, %v477_v50, 0.0  ;;  %v483_v4 = vsel %vm461_vm5, %v481_v62, 0.0  ;;  %v484_v6 = vsel %vm462_vm4, %v477_v50, 0.0  ;;  %v485_v7 = vsel %vm463_vm6, %v481_v62, 0.0  ;;  %963 = vmatpush1.msra.mxu1 %v402_v23  ;;  %v440_v23 = vld [vmem:[#allocation5 + $0x60] sm:$0xff] }
  0x64   :  { %v510_v32 = vadd.f32 %v1121_v45, %v484_v6  ;;  %v511_v8 = vadd.f32 %v1131_v48, %v485_v7  ;;  %v527_v58 = vrot.slane %v519_v1, %v1084_v22  ;;  %vm528_vm7 = vcmp.eq.s32.totalorder %v1072_v12, %v523_v59  ;;  %948 = vmatprep.subr.mxu1 %v401_v38  ;;  %v434_v38 = vld [vmem:[#allocation5 + $0x30] sm:$0xff] }
  0x65   :  { %vm530_vm8 = vcmp.eq.s32.totalorder %v1091_v25, %v523_v59  ;;  %v545_v52 = vrot.slane %v535_v60, %v1084_v22  ;;  %v549_v9 = vrot.slane %v539_v3, %v1084_v22  ;;  %vm117_vm9 = vcmp.eq.s32.totalorder %v1091_v25, %v1184_v5  ;;  %964 = vmatpush1.msra.mxu1 %v400_v42 }
  0x66   :  { %vm529_vm10 = vcmp.eq.s32.totalorder %v1072_v12, %v527_v58  ;;  %vm531_vm11 = vcmp.eq.s32.totalorder %v1091_v25, %v527_v58  ;;  %v168_v45 = vsel %vm117_vm9, %v1206_v13, 0.0  ;;  %vm315_vm12 = vcmp.eq.s32.totalorder %v1091_v25, %v1209_v14  ;;  %949 = vmatprep.subr.mxu1 %v399_v51 }
  0x67   :  { %v550_v48 = vsel %vm528_vm7, %v545_v52, 0.0  ;;  %v551_v15 = vsel %vm529_vm10, %v549_v9, 0.0  ;;  %v552_v16 = vsel %vm530_vm8, %v545_v52, 0.0  ;;  %v553_v20 = vsel %vm531_vm11, %v549_v9, 0.0 }
  0x68   :  { %v1431_v21 = vadd.f32 %v550_v48, %v482_v47  ;;  %v1433_v37 = vadd.f32 %v551_v15, %v483_v4  ;;  %v1435_v53 = vadd.f32 %v552_v16, %v510_v32  ;;  %v1437_v24 = vadd.f32 %v553_v20, %v511_v8 }
  0x69   :  { %v267_v29 = vadd.f32 %v1169_v63, %v168_v45  ;;  %v366_v30 = vsel %vm315_vm12, %v1232_v28, 0.0  ;;  %vm116_vm13 = vcmp.eq.s32.totalorder %v1072_v12, %v1177_v2  ;;  %vm314_vm14 = vcmp.eq.s32.totalorder %v1072_v12, %v1201_v11  ;;  %v436_v11 = vld [vmem:[#allocation5 + $0x40] sm:$0xff] }
  0x6a   :  { %v167_v25 = vsel %vm116_vm13, %v1198_v10, 0.0  ;;  %v365_v17 = vsel %vm314_vm14, %v1229_v27, 0.0  ;;  %vm115_vm15 = vcmp.eq.s32.totalorder %v1072_v12, %v1184_v5  ;;  %vm313_vm0 = vcmp.eq.s32.totalorder %v1072_v12, %v1209_v14  ;;  %v429_v5 = vld [vmem:[#allocation5 + $0x8] sm:$0xff]  ;;  %v438_v14 = vld [vmem:[#allocation5 + $0x50] sm:$0xff]  ;;  %v431_v27 = vld [vmem:[#allocation5 + $0x18] sm:$0xff] }
  0x6b   :  { %v398_v33 = vadd.f32 %v366_v30, %v267_v29  ;;  %v397_v63 = vadd.f32 %v365_v17, %v167_v25  ;;  %v166_v54 = vsel %vm115_vm15, %v1206_v13, 0.0  ;;  %v364_v39 = vsel %vm313_vm0, %v1232_v28, 0.0  ;;  %v437_v10 = vld [vmem:[#allocation5 + $0x48] sm:$0xff]  ;;  %v430_v13 = vld [vmem:[#allocation5 + $0x10] sm:$0xff]  ;;  %v439_v28 = vld [vmem:[#allocation5 + $0x58] sm:$0xff] }
  0x6c   :  { %v396_v2 = vadd.f32 %v364_v39, %v166_v54  ;;  %v1476_v61 = vsub.s32 1, %v1072_v12  ;;  %v1481_v62 = vsub.s32 0, %v1072_v12  ;;  %v746_v7 = vrot.slane %v1431_v21, %v1084_v22 }
  0x6d   :  { %587 = vmatpush1.msra.mxu0 %v398_v33  ;;  %965 = vmatpush1.msra.mxu1 %v398_v33  ;;  %v1496_v32 = vsub.s32 4, %v1072_v12  ;;  %v1499_v58 = vsub.s32 5, %v1072_v12  ;;  %v750_v48 = vrot.slane %v1433_v37, %v1084_v22  ;;  %v758_v15 = vrot.slane %v1431_v21, %v1078_v18 }
  0x6e   :  { %588 = vmatprep.subr.mxu0 %v397_v63  ;;  %950 = vmatprep.subr.mxu1 %v397_v63  ;;  %v734_v60 = vrot.slane %v1431_v21, %v1476_v61  ;;  %v722_v4 = vrot.slane %v1431_v21, %v1481_v62  ;;  %v738_v6 = vrot.slane %v1433_v37, %v1476_v61 }
  0x6f   :  { %589 = vmatpush1.msra.mxu0 %v396_v2  ;;  %966 = vmatpush1.msra.mxu1 %v396_v2  ;;  %v726_v9 = vrot.slane %v1433_v37, %v1481_v62  ;;  %v762_v16 = vrot.slane %v1433_v37, %v1078_v18  ;;  %v770_v17 = vrot.slane %v1431_v21, %v1496_v32 }
  0x70   :  { %623 = vmatmul.mubr.f32.vlgmr.msra.gmra.mxu0 %v428_v34  ;;  %671 = vmatmul.mubr.f32.vlgmr.msra.gmra.mxu1 %v436_v11  ;;  %v774_v63 = vrot.slane %v1433_v37, %v1496_v32  ;;  %v782_v54 = vrot.slane %v1431_v21, %v1499_v58 }
  0x71   :  { %628 = vmatprep.mubr.f32.mxu0 %v1047_v0  ;;  %676 = vmatprep.mubr.f32.mxu1 %v1047_v0 }
  0x74   :  { %629 = vmatmul.mubr.f32.gmra.mxu0 %v429_v5  ;;  %677 = vmatmul.mubr.f32.gmra.mxu1 %v437_v10  ;;  %v786_v10 = vrot.slane %v1433_v37, %v1499_v58 }
  0x75   :  { %634 = vmatprep.mubr.f32.mxu0 %v1047_v0  ;;  %682 = vmatprep.mubr.f32.mxu1 %v1047_v0 }
  0x78   :  { %635 = vmatmul.mubr.f32.gmra.mxu0 %v430_v13  ;;  %683 = vmatmul.mubr.f32.gmra.mxu1 %v438_v14  ;;  %v794_v13 = vrot.slane %v1431_v21, %v1094_v26 }
  0x79   :  { %640 = vmatprep.mubr.f32.mxu0 %v1047_v0  ;;  %688 = vmatprep.mubr.f32.mxu1 %v1047_v0 }
  0x7c   :  { %641 = vmatmul.mubr.f32.gmra.mxu0 %v431_v27  ;;  %689 = vmatmul.mubr.f32.gmra.mxu1 %v439_v28 }
  0x7d   :  { %646 = vmatprep.mubr.f32.mxu0 %v1047_v0  ;;  %694 = vmatprep.mubr.f32.mxu1 %v1047_v0 }
  0x80   :  { %647 = vmatmul.mubr.f32.gmra.mxu0 %v432_v35  ;;  %695 = vmatmul.mubr.f32.gmra.mxu1 %v440_v23 }
  0x81   :  { %652 = vmatprep.mubr.f32.mxu0 %v1047_v0  ;;  %700 = vmatprep.mubr.f32.mxu1 %v1047_v0 }
  0x84   :  { %653 = vmatmul.mubr.f32.gmra.mxu0 %v433_v36  ;;  %701 = vmatmul.mubr.f32.gmra.mxu1 %v441_v55  ;;  %v798_v55 = vrot.slane %v1433_v37, %v1094_v26 }
  0x85   :  { %658 = vmatprep.mubr.f32.mxu0 %v1047_v0  ;;  %706 = vmatprep.mubr.f32.mxu1 %v1047_v0 }
  0x88   :  { %659 = vmatmul.mubr.f32.gmra.mxu0 %v434_v38  ;;  %707 = vmatmul.mubr.f32.gmra.mxu1 %v442_v44 }
  0x89   :  { %664 = vmatprep.mubr.f32.mxu0 %v1047_v0  ;;  %712 = vmatprep.mubr.f32.mxu1 %v1047_v0 }
  0x8c   :  { %665 = vmatmul.mubr.f32.gmra.mxu0 %v435_v40  ;;  %713 = vmatmul.mubr.f32.gmra.mxu1 %v443_v41 }
 0x130   :  { %v624_v42 = vpop.f32.mrf.mxu0  ;;  %v1467_v43 = vpop.f32.mrf.mxu1 }
 0x131   :  { %v727_v12 = vmul.f32 %v722_v4, %v624_v42 }
 0x132   :  { %v626_v56 = vpop.f32.mrf.mxu0  ;;  %v1469_v31 = vpop.f32.mrf.mxu1 }
 0x133   :  { %v728_v39 = vmul.f32 %v726_v9, %v626_v56  ;;  %v806_v56 = vrot.slane %v1431_v21, %v1081_v19  ;;  %v810_v9 = vrot.slane %v1433_v37, %v1081_v19 }
 0x134   :  { %v630_v46 = vpop.f32.mrf.mxu0  ;;  %v1471_v49 = vpop.f32.mrf.mxu1 }
 0x135   :  { %v739_v45 = vmul.f32 %v734_v60, %v630_v46 }
 0x136   :  { %v632_v57 = vpop.f32.mrf.mxu0  ;;  %v1473_v51 = vpop.f32.mrf.mxu1 }
 0x137   :  { %v740_v30 = vmul.f32 %v738_v6, %v632_v57  ;;  %v741_v2 = vadd.f32 %v739_v45, %v727_v12  ;;  %v822_v45 = vrot.slane %v1437_v24, %v1481_v62 }
 0x138   :  { %v636_v50 = vpop.f32.mrf.mxu0  ;;  %v1478_v0 = vpop.f32.mrf.mxu1 }
 0x139   :  { %v751_v25 = vmul.f32 %v746_v7, %v636_v50  ;;  %v742_v27 = vadd.f32 %v740_v30, %v728_v39  ;;  %v834_v30 = vrot.slane %v1437_v24, %v1476_v61  ;;  %v854_v39 = vrot.slane %v1435_v53, %v1078_v18 }
 0x13a   :  { %v638_v1 = vpop.f32.mrf.mxu0  ;;  %v1483_v59 = vpop.f32.mrf.mxu1 }
 0x13b   :  { %v752_v34 = vmul.f32 %v750_v48, %v638_v1  ;;  %v753_v28 = vadd.f32 %v751_v25, %v741_v2  ;;  %v842_v25 = vrot.slane %v1435_v53, %v1084_v22 }
 0x13c   :  { %v642_v3 = vpop.f32.mrf.mxu0  ;;  %v1487_v47 = vpop.f32.mrf.mxu1 }
 0x13d   :  { %v763_v11 = vmul.f32 %v758_v15, %v642_v3  ;;  %v754_v38 = vadd.f32 %v752_v34, %v742_v27  ;;  %v818_v3 = vrot.slane %v1435_v53, %v1481_v62  ;;  %v830_v15 = vrot.slane %v1435_v53, %v1476_v61 }
 0x13e   :  { %v644_v8 = vpop.f32.mrf.mxu0  ;;  %v1501_v52 = vpop.f32.mrf.mxu1  ;;  %v824_v34 = vmul.f32 %v822_v45, %v1469_v31  ;;  %v878_v31 = vrot.slane %v1435_v53, %v1499_v58 }
 0x13f   :  { %v764_v35 = vmul.f32 %v762_v16, %v644_v8  ;;  %v765_v44 = vadd.f32 %v763_v11, %v753_v28  ;;  %v823_v37 = vmul.f32 %v818_v3, %v1467_v43  ;;  %v835_v61 = vmul.f32 %v830_v15, %v1471_v49 }
 0x140   :  { %v648_v20 = vpop.f32.mrf.mxu0  ;;  %v1511_v29 = vpop.f32.mrf.mxu1  ;;  %v866_v43 = vrot.slane %v1435_v53, %v1496_v32 }
 0x141   :  { %v775_v23 = vmul.f32 %v770_v17, %v648_v20  ;;  %v766_v57 = vadd.f32 %v764_v35, %v754_v38  ;;  %v870_v35 = vrot.slane %v1437_v24, %v1496_v32  ;;  %v902_v38 = vrot.slane %v1435_v53, %v1081_v19 }
 0x142   :  { %v650_v33 = vpop.f32.mrf.mxu0  ;;  %v1523_v14 = vpop.f32.mrf.mxu1 }
 0x143   :  { %v776_v40 = vmul.f32 %v774_v63, %v650_v33  ;;  %v777_v50 = vadd.f32 %v775_v23, %v765_v44 }
 0x144   :  { %v654_v5 = vpop.f32.mrf.mxu0  ;;  %v702_v46 = vpop.f32.mrf.mxu1 }
 0x145   :  { %v787_v41 = vmul.f32 %v782_v54, %v654_v5  ;;  %v778_v6 = vadd.f32 %v776_v40, %v766_v57  ;;  %v846_v54 = vrot.slane %v1437_v24, %v1084_v22  ;;  %v847_v22 = vmul.f32 %v842_v25, %v1478_v0 }
 0x146   :  { %v656_v36 = vpop.f32.mrf.mxu0  ;;  %v704_v21 = vpop.f32.mrf.mxu1  ;;  %v890_v0 = vrot.slane %v1435_v53, %v1094_v26  ;;  %v871_v40 = vmul.f32 %v866_v43, %v1511_v29  ;;  %v883_v57 = vmul.f32 %v878_v31, %v702_v46 }
 0x147   :  { %v788_v1 = vmul.f32 %v786_v10, %v656_v36  ;;  %v789_v7 = vadd.f32 %v787_v41, %v777_v50  ;;  %v858_v10 = vrot.slane %v1437_v24, %v1078_v18  ;;  %v848_v23 = vmul.f32 %v846_v54, %v1483_v59 }
 0x148   :  { %v660_v42 = vpop.f32.mrf.mxu0  ;;  %v708_v2 = vpop.f32.mrf.mxu1  ;;  %v859_v18 = vmul.f32 %v854_v39, %v1487_v47  ;;  %v894_v59 = vrot.slane %v1437_v24, %v1094_v26 }
 0x149   :  { %v799_v60 = vmul.f32 %v794_v13, %v660_v42  ;;  %v790_v16 = vadd.f32 %v788_v1, %v778_v6  ;;  %v836_v13 = vmul.f32 %v834_v30, %v1473_v51  ;;  %v882_v51 = vrot.slane %v1437_v24, %v1499_v58 }
 0x14a   :  { %v662_v4 = vpop.f32.mrf.mxu0  ;;  %v710_v49 = vpop.f32.mrf.mxu1  ;;  %v860_v32 = vmul.f32 %v858_v10, %v1501_v52  ;;  %v872_v58 = vmul.f32 %v870_v35, %v1523_v14  ;;  %v906_v1 = vrot.slane %v1437_v24, %v1081_v19  ;;  %v895_v52 = vmul.f32 %v890_v0, %v708_v2 }
 0x14b   :  { %v800_v8 = vmul.f32 %v798_v55, %v662_v4  ;;  %v801_v20 = vadd.f32 %v799_v60, %v789_v7  ;;  %v884_v50 = vmul.f32 %v882_v51, %v704_v21  ;;  %v896_v7 = vmul.f32 %v894_v59, %v710_v49 }
 0x14c   :  { %v666_v48 = vpop.f32.mrf.mxu0  ;;  %v714_v47 = vpop.f32.mrf.mxu1 }
 0x14d   :  { %v811_v12 = vmul.f32 %v806_v56, %v666_v48  ;;  %v802_v33 = vadd.f32 %v800_v8, %v790_v16  ;;  %v907_v3 = vmul.f32 %v902_v38, %v714_v47 }
 0x14e   :  { %v668_v17 = vpop.f32.mrf.mxu0  ;;  %v716_v4 = vpop.f32.mrf.mxu1 }
 0x14f   :  { %v813_v63 = vadd.f32 %v811_v12, %v801_v20  ;;  %v812_v62 = vmul.f32 %v810_v9, %v668_v17  ;;  %v908_v9 = vmul.f32 %v906_v1, %v716_v4 }
 0x151   :  { %v825_v11 = vadd.f32 %v823_v37, %v813_v63  ;;  %v814_v5 = vadd.f32 %v812_v62, %v802_v33 }
 0x153   :  { %v837_v27 = vadd.f32 %v835_v61, %v825_v11  ;;  %v826_v28 = vadd.f32 %v824_v34, %v814_v5 }
 0x155   :  { %v838_v36 = vadd.f32 %v836_v13, %v826_v28  ;;  %v849_v55 = vadd.f32 %v847_v22, %v837_v27 }
 0x157   :  { %v861_v44 = vadd.f32 %v859_v18, %v849_v55  ;;  %v850_v41 = vadd.f32 %v848_v23, %v838_v36 }
 0x159   :  { %v873_v42 = vadd.f32 %v871_v40, %v861_v44  ;;  %v862_v56 = vadd.f32 %v860_v32, %v850_v41 }
 0x15b   :  { %v874_v53 = vadd.f32 %v872_v58, %v862_v56  ;;  %v885_v60 = vadd.f32 %v883_v57, %v873_v42 }
 0x15d   :  { %v886_v29 = vadd.f32 %v884_v50, %v874_v53  ;;  %v897_v6 = vadd.f32 %v895_v52, %v885_v60 }
 0x15f   :  { %v898_v26 = vadd.f32 %v896_v7, %v886_v29  ;;  %v909_v8 = vadd.f32 %v907_v3, %v897_v6 }
 0x161   :  { %911 = vst [vmem:[#allocation7] sm:$0xff] %v909_v8  ;;  %v910_v14 = vadd.f32 %v908_v9, %v898_v26 }
 0x163   :  { %912 = vst [vmem:[#allocation7 + $0x8] sm:$0xff] %v910_v14 }
 0x164   :  { %1028 = shalt.err (!%p1025_p0)
}
 0x165   :  { %922 = dma.vmem_to_hbm [thread:$0]  %s920_s1, 256, %s1578_s2, [#allocation4]  }
 0x166   :  { %1041 = dma.done.wait [#allocation4], 256  }
 0x167   :  { %1042 = vsyncadd [#allocation4], 4294967040 }
 0x168   :  { %926 = vsyncpa [#allocation3], 1 }
 0x169   :  { %927 = vsyncpa [#allocation6], 1 }
 0x16a   :  { %928 = vsyncpa [#allocation4], 1 }

</bundles_post_ra>
